<compile_context>
chip_gen: v7x
topology: tpu7x:2x2x1
jax: 0.10.0
libtpu: 0.0.40
codegen_flags: <defaults>
</compile_context>

<pallas_src>
import jax
import jax.numpy as jnp
import numpy as np
from jax.experimental import pallas as pl
from jax.experimental.pallas import tpu as pltpu


# --------------------------------- helpers -----------------------------------
def _zero_halo(scr):
    """Zero only the 1-px padding border of a (B, H+2, W+2, C) scratch."""
    b, hp, wp, c = scr.shape
    zrow = jnp.zeros((b, 1, wp, c), scr.dtype)
    zcol = jnp.zeros((b, hp, 1, c), scr.dtype)
    scr[:, 0:1, :, :] = zrow
    scr[:, hp - 1:hp, :, :] = zrow
    scr[:, :, 0:1, :] = zcol
    scr[:, :, wp - 1:wp, :] = zcol


def _conv3x3_bn_relu(k_blocks, b_ref, m_rows, h, w):
    """3x3 SAME conv as 9 tap-accumulated MXU dots + folded-BN bias + ReLU.

    k_blocks: list of (padded scratch ref (B, H+2, W+2, cin) f32,
                       weight ref (9, cin, cout) bf16) K-blocks.
    Returns an (m_rows, cout) f32 array.
    """
    cout = b_ref.shape[-1]
    acc = jnp.zeros((m_rows, cout), jnp.float32)
    for scr, w_ref in k_blocks:
        cin = scr.shape[-1]
        for dh in range(3):
            for dw in range(3):
                patch = scr[:, dh:dh + h, dw:dw + w, :].reshape(m_rows, cin)
                acc = acc + jnp.dot(patch.astype(jnp.bfloat16),  # bf16 MXU in
                                    w_ref[dh * 3 + dw],
                                    preferred_element_type=jnp.float32)
    return jnp.maximum(acc + b_ref[...], 0.0)


# ------------------------- fused Down-block kernel ----------------------------
def _down_fused_kernel(x_ref, x2_ref, w1a_ref, w1b_ref, b1_ref, w2_ref, b2_ref,
                       o_ref, xd_scr, x2p_scr, hp_scr):
    # x_ref  : (B, H, 2, W, 2*C1) high-res tile; row taps on axis 2, column taps
    #                             folded into the lane dim.
    # x2_ref : (B, H, W, C2)      low-res branch (concat partner).
    # w1a_ref: (9, C1, Cmid)      conv1 weights (pooled-channel K-block), bf16.
    # w1b_ref: (9, C2, Cmid)      conv1 weights (x2-channel K-block), bf16.
    # b1_ref : (1, Cmid)          folded BN1 bias, f32.
    # w2_ref : (9, Cmid, Cout)    conv2 weights, bf16.
    # b2_ref : (1, Cout)          folded BN2 bias, f32.
    # o_ref  : (B, H*W, Cout)     flat output tile (reshaped to NHWC outside).
    # *_scr  : padded staging scratches (f32 for robust unaligned stores; the
    #          MXU inputs are cast to bf16 at the dot).
    B, H, W, _ = x2_ref.shape
    C1 = x_ref.shape[-1] // 2
    Cmid = b1_ref.shape[-1]
    Cout = b2_ref.shape[-1]
    M = B * H * W

    # Zero only the halo strips; the interiors are fully overwritten below.
    _zero_halo(xd_scr)
    _zero_halo(x2p_scr)
    _zero_halo(hp_scr)

    # ---- MaxPool2d(2): entirely in registers ----
    rows_even = x_ref[:, :, 0]                       # (B, H, W, 2*C1) rows 2h
    rows_odd = x_ref[:, :, 1]                        # rows 2h+1
    m = jnp.maximum(rows_even, rows_odd)
    xd = jnp.maximum(m[..., :C1], m[..., C1:])       # (B, H, W, C1) pooled

    # ---- stage conv1 inputs; the channel concat stays virtual (two scratches,
    #      two matmul K-blocks) so no masked lane-offset stores ----
    xd_scr[:, 1:H + 1, 1:W + 1, :] = xd
    x2p_scr[:, 1:H + 1, 1:W + 1, :] = x2_ref[...]

    # ---- conv1 + folded BN1 + ReLU ----
    h1 = _conv3x3_bn_relu([(xd_scr, w1a_ref), (x2p_scr, w1b_ref)],
                          b1_ref, M, H, W)           # (M, Cmid) f32

    # ---- stage the hidden activation for conv2 (VMEM only) ----
    hp_scr[:, 1:H + 1, 1:W + 1, :] = h1.reshape(B, H, W, Cmid)

    # ---- conv2 + folded BN2 + ReLU ----
    y = _conv3x3_bn_relu([(hp_scr, w2_ref)], b2_ref, M, H, W)   # (M, Cout) f32
    o_ref[...] = y.reshape(B, H * W, Cout)


# ------------------------------- Down.forward ---------------------------------
def down_forward(x, x2, p, eps=1e-5):
    # x:  (N, 2H, 2W, C1)  high-res branch, maxpooled by 2
    # x2: (N, H,  W,  C2)  low-res branch, concatenated on channels
    N, H2, W2, C1 = x.shape
    _, H, W, C2 = x2.shape
    Cin = C1 + C2
    Cmid = p["w1"].shape[-1]
    Cout = p["w2"].shape[-1]

    # Fold BatchNorm (inference mode) into the conv weights / a bias.
    s1 = (p["g1"] / jnp.sqrt(p["v1"] + eps)).astype(jnp.float32)
    w1f = p["w1"].astype(jnp.float32) * s1                      # (3,3,Cin,Cmid)
    b1 = (p["b1"] - p["m1"] * s1).reshape(1, Cmid).astype(jnp.float32)
    s2 = (p["g2"] / jnp.sqrt(p["v2"] + eps)).astype(jnp.float32)
    w2f = p["w2"].astype(jnp.float32) * s2                      # (3,3,Cmid,Cout)
    b2 = (p["b2"] - p["m2"] * s2).reshape(1, Cout).astype(jnp.float32)

    # bf16 MXU weights; conv1 split into the pooled / skip K-blocks matching
    # the (never materialized) channel concat.
    w1a = w1f[:, :, :C1, :].reshape(9, C1, Cmid).astype(jnp.bfloat16)
    w1b = w1f[:, :, C1:, :].reshape(9, C2, Cmid).astype(jnp.bfloat16)
    w2k = w2f.reshape(9, Cmid, Cout).astype(jnp.bfloat16)

    # ---- batch blocking: fatten the matmul M dim (M = B*H*W) ----
    B = 1
    for cand in range(1, N + 1):
        if N % cand == 0 and cand * H * W <= 1024:
            B = cand

    # ---- VMEM budget for the chosen tile (double-buffered blocks + scratch),
    #      never lowered below the 32 MiB default ----
    f4, f2 = 4, 2
    blk_bytes = 2 * (B * H * 2 * W * 2 * C1 * f4 + B * H * W * C2 * f4 +
                     B * H * W * Cout * f4 +
                     9 * (C1 + C2) * Cmid * f2 + 9 * Cmid * Cout * f2 +
                     (Cmid + Cout) * f4)
    scr_bytes = B * (H + 2) * (W + 2) * (C1 + C2 + Cmid) * f4
    vmem_limit = int(min(100 * 2 ** 20,
                         max(32 * 2 ** 20, 1.5 * (blk_bytes + scr_bytes))))

    cost = pl.CostEstimate(
        flops=2 * N * H * W * 9 * (Cin * Cmid + Cmid * Cout),
        transcendentals=0,
        bytes_accessed=int(x.size * f4 + x2.size * f4 + N * H * W * Cout * f4 +
                           9 * (Cin * Cmid + Cmid * Cout) * f2 +
                           (Cmid + Cout) * f4),
    )

    # Free contiguous view (no transpose, no copy): split the two pooling row
    # taps onto their own axis and fold the two column taps into the lane dim.
    x_r = x.reshape(N, H, 2, W, 2 * C1)

    out_flat = pl.pallas_call(
        _down_fused_kernel,
        out_shape=jax.ShapeDtypeStruct((N, H * W, Cout), jnp.float32),
        grid=(N // B,),
        in_specs=[
            pl.BlockSpec((B, H, 2, W, 2 * C1), lambda n: (n, 0, 0, 0, 0)),
            pl.BlockSpec((B, H, W, C2), lambda n: (n, 0, 0, 0)),
            pl.BlockSpec((9, C1, Cmid), lambda n: (0, 0, 0)),
            pl.BlockSpec((9, C2, Cmid), lambda n: (0, 0, 0)),
            pl.BlockSpec((1, Cmid), lambda n: (0, 0)),
            pl.BlockSpec((9, Cmid, Cout), lambda n: (0, 0, 0)),
            pl.BlockSpec((1, Cout), lambda n: (0, 0)),
        ],
        out_specs=pl.BlockSpec((B, H * W, Cout), lambda n: (n, 0, 0)),
        scratch_shapes=[
            pltpu.VMEM((B, H + 2, W + 2, C1), jnp.float32),
            pltpu.VMEM((B, H + 2, W + 2, C2), jnp.float32),
            pltpu.VMEM((B, H + 2, W + 2, Cmid), jnp.float32),
        ],
        compiler_params=pltpu.CompilerParams(
            dimension_semantics=("parallel",),
            vmem_limit_bytes=vmem_limit),
        cost_estimate=cost,
    )(x_r, x2, w1a, w1b, b1, w2k, b2)

    # Free contiguous reshape back to NHWC.
    return out_flat.reshape(N, H, W, Cout)


# ------------------------------ pure-JAX reference ----------------------------
def _ref_forward(x, x2, p, eps=1e-5):
    N, H2, W2, C1 = x.shape
    H, W = H2 // 2, W2 // 2
    xd = x.reshape(N, H, 2, W, 2, C1).max(axis=(2, 4))
    xc = jnp.concatenate([xd, x2], axis=-1)

    def cbr(z, w, g, b, m, v):
        y = jax.lax.conv_general_dilated(
            z, w, (1, 1), "SAME", dimension_numbers=("NHWC", "HWIO", "NHWC"))
        y = (y - m) / jnp.sqrt(v + eps) * g + b
        return jnp.maximum(y, 0.0)

    h = cbr(xc, p["w1"], p["g1"], p["b1"], p["m1"], p["v1"])
    return cbr(h, p["w2"], p["g2"], p["b2"], p["m2"], p["v2"])


# ----------------------------------- main --------------------------------------
if __name__ == "__main__":
    key = jax.random.PRNGKey(0)
    ks = jax.random.split(key, 12)

    N = 2
    C1, C2 = 2, 2                 # x channels, x2 channels
    Cin = C1 + C2                 # DoubleConv in_channels = 4
    Cmid = Cout = 8               # DoubleConv out_channels = 8 (mid = out)
    Hx = Wx = 16                  # x spatial (pooled to 8x8)
    H = W = Hx // 2

    x = jax.random.normal(ks[0], (N, Hx, Wx, C1), jnp.float32)
    x2 = jax.random.normal(ks[1], (N, H, W, C2), jnp.float32)

    params = {
        # conv1: 3x3, Cin -> Cmid, no bias (HWIO layout)
        "w1": 0.1 * jax.random.normal(ks[2], (3, 3, Cin, Cmid), jnp.float32),
        "g1": 0.5 + jax.random.uniform(ks[3], (Cmid,), jnp.float32),
        "b1": 0.1 * jax.random.normal(ks[4], (Cmid,), jnp.float32),
        "m1": 0.1 * jax.random.normal(ks[5], (Cmid,), jnp.float32),
        "v1": 0.5 + jax.random.uniform(ks[6], (Cmid,), jnp.float32),
        # conv2: 3x3, Cmid -> Cout, no bias
        "w2": 0.1 * jax.random.normal(ks[7], (3, 3, Cmid, Cout), jnp.float32),
        "g2": 0.5 + jax.random.uniform(ks[8], (Cout,), jnp.float32),
        "b2": 0.1 * jax.random.normal(ks[9], (Cout,), jnp.float32),
        "m2": 0.1 * jax.random.normal(ks[10], (Cout,), jnp.float32),
        "v2": 0.5 + jax.random.uniform(ks[11], (Cout,), jnp.float32),
    }

    out = jax.block_until_ready(down_forward(x, x2, params))
    ref = jax.block_until_ready(_ref_forward(x, x2, params))

    assert out.shape == (N, H, W, Cout), out.shape
    # Kernel uses bf16 MXU operands (per perf review); compare against the pure
    # f32 reference with correspondingly relaxed tolerances.
    np.testing.assert_allclose(np.asarray(out), np.asarray(ref),
                               rtol=3e-2, atol=3e-2)

    print("KERNEL_OK")
</pallas_src>

<mosaic_0001>
module attributes {stable_mosaic.version = 11 : i64} {
  func.func @_down_fused_kernel(%arg0: i32, %arg1: memref<2x8x2x8x4xf32, #tpu.memory_space<vmem>>, %arg2: memref<2x8x8x2xf32, #tpu.memory_space<vmem>>, %arg3: memref<9x2x8xbf16, #tpu.memory_space<vmem>>, %arg4: memref<9x2x8xbf16, #tpu.memory_space<vmem>>, %arg5: memref<1x8xf32, #tpu.memory_space<vmem>>, %arg6: memref<9x8x8xbf16, #tpu.memory_space<vmem>>, %arg7: memref<1x8xf32, #tpu.memory_space<vmem>>, %arg8: memref<2x64x8xf32, #tpu.memory_space<vmem>>, %arg9: memref<2x10x10x2xf32, #tpu.memory_space<vmem>>, %arg10: memref<2x10x10x2xf32, #tpu.memory_space<vmem>>, %arg11: memref<2x10x10x8xf32, #tpu.memory_space<vmem>>) attributes {dimension_semantics = [#tpu.dimension_semantics<parallel>], iteration_bounds = array<i64: 1>, scalar_prefetch = 0 : i64, scratch_operands = 3 : i64, tpu.core_type = #tpu.core_type<tc>, window_params = [{transform_indices = @transform_0, window_bounds = array<i64: 2, 8, 2, 8, 4>}, {transform_indices = @transform_1, window_bounds = array<i64: 2, 8, 8, 2>}, {pipeline_mode = #tpu.pipeline_mode<synchronous>, transform_indices = @transform_2, window_bounds = array<i64: 9, 2, 8>}, {pipeline_mode = #tpu.pipeline_mode<synchronous>, transform_indices = @transform_3, window_bounds = array<i64: 9, 2, 8>}, {pipeline_mode = #tpu.pipeline_mode<synchronous>, transform_indices = @transform_4, window_bounds = array<i64: 1, 8>}, {pipeline_mode = #tpu.pipeline_mode<synchronous>, transform_indices = @transform_5, window_bounds = array<i64: 9, 8, 8>}, {pipeline_mode = #tpu.pipeline_mode<synchronous>, transform_indices = @transform_6, window_bounds = array<i64: 1, 8>}, {transform_indices = @transform_7, window_bounds = array<i64: 2, 64, 8>}]} {
    %cst = arith.constant 0.000000e+00 : f32
    %0 = vector.broadcast %cst : f32 to vector<2x1x10x2xf32>
    %cst_0 = arith.constant 0.000000e+00 : f32
    %1 = vector.broadcast %cst_0 : f32 to vector<2x10x1x2xf32>
    %c0 = arith.constant 0 : index
    %c0_1 = arith.constant 0 : index
    %c0_2 = arith.constant 0 : index
    %c0_3 = arith.constant 0 : index
    %2 = vector.load %arg9[%c0, %c0_1, %c0_2, %c0_3] : memref<2x10x10x2xf32, #tpu.memory_space<vmem>>, vector<2x1x10x2xf32>
    tpu.vector_store %arg9[%c0, %c0_1, %c0_2, %c0_3], %0 {strides = array<i32>} : memref<2x10x10x2xf32, #tpu.memory_space<vmem>>, vector<2x1x10x2xf32>,
    %c0_4 = arith.constant 0 : index
    %c9 = arith.constant 9 : index
    %c0_5 = arith.constant 0 : index
    %c0_6 = arith.constant 0 : index
    %3 = vector.load %arg9[%c0_4, %c9, %c0_5, %c0_6] : memref<2x10x10x2xf32, #tpu.memory_space<vmem>>, vector<2x1x10x2xf32>
    tpu.vector_store %arg9[%c0_4, %c9, %c0_5, %c0_6], %0 {strides = array<i32>} : memref<2x10x10x2xf32, #tpu.memory_space<vmem>>, vector<2x1x10x2xf32>,
    %c0_7 = arith.constant 0 : index
    %c0_8 = arith.constant 0 : index
    %c0_9 = arith.constant 0 : index
    %c0_10 = arith.constant 0 : index
    %4 = vector.load %arg9[%c0_7, %c0_8, %c0_9, %c0_10] : memref<2x10x10x2xf32, #tpu.memory_space<vmem>>, vector<2x10x1x2xf32>
    tpu.vector_store %arg9[%c0_7, %c0_8, %c0_9, %c0_10], %1 {strides = array<i32>} : memref<2x10x10x2xf32, #tpu.memory_space<vmem>>, vector<2x10x1x2xf32>,
    %c0_11 = arith.constant 0 : index
    %c0_12 = arith.constant 0 : index
    %c9_13 = arith.constant 9 : index
    %c0_14 = arith.constant 0 : index
    %5 = vector.load %arg9[%c0_11, %c0_12, %c9_13, %c0_14] : memref<2x10x10x2xf32, #tpu.memory_space<vmem>>, vector<2x10x1x2xf32>
    tpu.vector_store %arg9[%c0_11, %c0_12, %c9_13, %c0_14], %1 {strides = array<i32>} : memref<2x10x10x2xf32, #tpu.memory_space<vmem>>, vector<2x10x1x2xf32>,
    %cst_15 = arith.constant 0.000000e+00 : f32
    %6 = vector.broadcast %cst_15 : f32 to vector<2x1x10x2xf32>
    %cst_16 = arith.constant 0.000000e+00 : f32
    %7 = vector.broadcast %cst_16 : f32 to vector<2x10x1x2xf32>
    %c0_17 = arith.constant 0 : index
    %c0_18 = arith.constant 0 : index
    %c0_19 = arith.constant 0 : index
    %c0_20 = arith.constant 0 : index
    %8 = vector.load %arg10[%c0_17, %c0_18, %c0_19, %c0_20] : memref<2x10x10x2xf32, #tpu.memory_space<vmem>>, vector<2x1x10x2xf32>
    tpu.vector_store %arg10[%c0_17, %c0_18, %c0_19, %c0_20], %6 {strides = array<i32>} : memref<2x10x10x2xf32, #tpu.memory_space<vmem>>, vector<2x1x10x2xf32>,
    %c0_21 = arith.constant 0 : index
    %c9_22 = arith.constant 9 : index
    %c0_23 = arith.constant 0 : index
    %c0_24 = arith.constant 0 : index
    %9 = vector.load %arg10[%c0_21, %c9_22, %c0_23, %c0_24] : memref<2x10x10x2xf32, #tpu.memory_space<vmem>>, vector<2x1x10x2xf32>
    tpu.vector_store %arg10[%c0_21, %c9_22, %c0_23, %c0_24], %6 {strides = array<i32>} : memref<2x10x10x2xf32, #tpu.memory_space<vmem>>, vector<2x1x10x2xf32>,
    %c0_25 = arith.constant 0 : index
    %c0_26 = arith.constant 0 : index
    %c0_27 = arith.constant 0 : index
    %c0_28 = arith.constant 0 : index
    %10 = vector.load %arg10[%c0_25, %c0_26, %c0_27, %c0_28] : memref<2x10x10x2xf32, #tpu.memory_space<vmem>>, vector<2x10x1x2xf32>
    tpu.vector_store %arg10[%c0_25, %c0_26, %c0_27, %c0_28], %7 {strides = array<i32>} : memref<2x10x10x2xf32, #tpu.memory_space<vmem>>, vector<2x10x1x2xf32>,
    %c0_29 = arith.constant 0 : index
    %c0_30 = arith.constant 0 : index
    %c9_31 = arith.constant 9 : index
    %c0_32 = arith.constant 0 : index
    %11 = vector.load %arg10[%c0_29, %c0_30, %c9_31, %c0_32] : memref<2x10x10x2xf32, #tpu.memory_space<vmem>>, vector<2x10x1x2xf32>
    tpu.vector_store %arg10[%c0_29, %c0_30, %c9_31, %c0_32], %7 {strides = array<i32>} : memref<2x10x10x2xf32, #tpu.memory_space<vmem>>, vector<2x10x1x2xf32>,
    %cst_33 = arith.constant 0.000000e+00 : f32
    %12 = vector.broadcast %cst_33 : f32 to vector<2x1x10x8xf32>
    %cst_34 = arith.constant 0.000000e+00 : f32
    %13 = vector.broadcast %cst_34 : f32 to vector<2x10x1x8xf32>
    %c0_35 = arith.constant 0 : index
    %c0_36 = arith.constant 0 : index
    %c0_37 = arith.constant 0 : index
    %c0_38 = arith.constant 0 : index
    %14 = vector.load %arg11[%c0_35, %c0_36, %c0_37, %c0_38] : memref<2x10x10x8xf32, #tpu.memory_space<vmem>>, vector<2x1x10x8xf32>
    tpu.vector_store %arg11[%c0_35, %c0_36, %c0_37, %c0_38], %12 {strides = array<i32>} : memref<2x10x10x8xf32, #tpu.memory_space<vmem>>, vector<2x1x10x8xf32>,
    %c0_39 = arith.constant 0 : index
    %c9_40 = arith.constant 9 : index
    %c0_41 = arith.constant 0 : index
    %c0_42 = arith.constant 0 : index
    %15 = vector.load %arg11[%c0_39, %c9_40, %c0_41, %c0_42] : memref<2x10x10x8xf32, #tpu.memory_space<vmem>>, vector<2x1x10x8xf32>
    tpu.vector_store %arg11[%c0_39, %c9_40, %c0_41, %c0_42], %12 {strides = array<i32>} : memref<2x10x10x8xf32, #tpu.memory_space<vmem>>, vector<2x1x10x8xf32>,
    %c0_43 = arith.constant 0 : index
    %c0_44 = arith.constant 0 : index
    %c0_45 = arith.constant 0 : index
    %c0_46 = arith.constant 0 : index
    %16 = vector.load %arg11[%c0_43, %c0_44, %c0_45, %c0_46] : memref<2x10x10x8xf32, #tpu.memory_space<vmem>>, vector<2x10x1x8xf32>
    tpu.vector_store %arg11[%c0_43, %c0_44, %c0_45, %c0_46], %13 {strides = array<i32>} : memref<2x10x10x8xf32, #tpu.memory_space<vmem>>, vector<2x10x1x8xf32>,
    %c0_47 = arith.constant 0 : index
    %c0_48 = arith.constant 0 : index
    %c9_49 = arith.constant 9 : index
    %c0_50 = arith.constant 0 : index
    %17 = vector.load %arg11[%c0_47, %c0_48, %c9_49, %c0_50] : memref<2x10x10x8xf32, #tpu.memory_space<vmem>>, vector<2x10x1x8xf32>
    tpu.vector_store %arg11[%c0_47, %c0_48, %c9_49, %c0_50], %13 {strides = array<i32>} : memref<2x10x10x8xf32, #tpu.memory_space<vmem>>, vector<2x10x1x8xf32>,
    %c0_51 = arith.constant 0 : index
    %c0_52 = arith.constant 0 : index
    %c0_53 = arith.constant 0 : index
    %c0_54 = arith.constant 0 : index
    %c0_55 = arith.constant 0 : index
    %18 = vector.load %arg1[%c0_51, %c0_52, %c0_53, %c0_54, %c0_55] : memref<2x8x2x8x4xf32, #tpu.memory_space<vmem>>, vector<2x8x1x8x4xf32>
    %19 = vector.shape_cast %18 : vector<2x8x1x8x4xf32> to vector<2x8x8x4xf32>
    %c0_56 = arith.constant 0 : index
    %c0_57 = arith.constant 0 : index
    %c1 = arith.constant 1 : index
    %c0_58 = arith.constant 0 : index
    %c0_59 = arith.constant 0 : index
    %20 = vector.load %arg1[%c0_56, %c0_57, %c1, %c0_58, %c0_59] : memref<2x8x2x8x4xf32, #tpu.memory_space<vmem>>, vector<2x8x1x8x4xf32>
    %21 = vector.shape_cast %20 : vector<2x8x1x8x4xf32> to vector<2x8x8x4xf32>
    %22 = arith.maximumf %19, %21 : vector<2x8x8x4xf32>
    %23 = vector.extract_strided_slice %22 {offsets = [0, 0, 0, 0], sizes = [2, 8, 8, 2], strides = [1, 1, 1, 1]} : vector<2x8x8x4xf32> to vector<2x8x8x2xf32>
    %24 = vector.extract_strided_slice %22 {offsets = [0, 0, 0, 2], sizes = [2, 8, 8, 2], strides = [1, 1, 1, 1]} : vector<2x8x8x4xf32> to vector<2x8x8x2xf32>
    %25 = arith.maximumf %23, %24 : vector<2x8x8x2xf32>
    %c0_60 = arith.constant 0 : index
    %c1_61 = arith.constant 1 : index
    %c1_62 = arith.constant 1 : index
    %c0_63 = arith.constant 0 : index
    %26 = vector.load %arg9[%c0_60, %c1_61, %c1_62, %c0_63] : memref<2x10x10x2xf32, #tpu.memory_space<vmem>>, vector<2x8x8x2xf32>
    tpu.vector_store %arg9[%c0_60, %c1_61, %c1_62, %c0_63], %25 {strides = array<i32>} : memref<2x10x10x2xf32, #tpu.memory_space<vmem>>, vector<2x8x8x2xf32>,
    %c0_64 = arith.constant 0 : index
    %c0_65 = arith.constant 0 : index
    %c0_66 = arith.constant 0 : index
    %c0_67 = arith.constant 0 : index
    %27 = vector.load %arg2[%c0_64, %c0_65, %c0_66, %c0_67] : memref<2x8x8x2xf32, #tpu.memory_space<vmem>>, vector<2x8x8x2xf32>
    %c0_68 = arith.constant 0 : index
    %c1_69 = arith.constant 1 : index
    %c1_70 = arith.constant 1 : index
    %c0_71 = arith.constant 0 : index
    %28 = vector.load %arg10[%c0_68, %c1_69, %c1_70, %c0_71] : memref<2x10x10x2xf32, #tpu.memory_space<vmem>>, vector<2x8x8x2xf32>
    tpu.vector_store %arg10[%c0_68, %c1_69, %c1_70, %c0_71], %27 {strides = array<i32>} : memref<2x10x10x2xf32, #tpu.memory_space<vmem>>, vector<2x8x8x2xf32>,
    %cst_72 = arith.constant 0.000000e+00 : f32
    %29 = vector.broadcast %cst_72 : f32 to vector<128x8xf32>
    %c0_73 = arith.constant 0 : index
    %c0_74 = arith.constant 0 : index
    %c0_75 = arith.constant 0 : index
    %c0_76 = arith.constant 0 : index
    %30 = vector.load %arg9[%c0_73, %c0_74, %c0_75, %c0_76] : memref<2x10x10x2xf32, #tpu.memory_space<vmem>>, vector<2x8x8x2xf32>
    %31 = vector.shape_cast %30 : vector<2x8x8x2xf32> to vector<128x2xf32>
    %32 = arith.truncf %31 : vector<128x2xf32> to vector<128x2xbf16>
    %c0_77 = arith.constant 0 : index
    %c0_78 = arith.constant 0 : index
    %c0_79 = arith.constant 0 : index
    %33 = vector.load %arg3[%c0_77, %c0_78, %c0_79] : memref<9x2x8xbf16, #tpu.memory_space<vmem>>, vector<1x2x8xbf16>
    %34 = vector.shape_cast %33 : vector<1x2x8xbf16> to vector<2x8xbf16>
    %cst_80 = arith.constant dense<0.000000e+00> : vector<128x8xf32>
    %35 = tpu.matmul %32, %34, %cst_80 {dimension_numbers = #tpu.dot_dimension_numbers<[1], [0], [0], [1], [0, 0, 1, 1], [], []>} : vector<128x2xbf16>, vector<2x8xbf16>, vector<128x8xf32> -> vector<128x8xf32>
    %36 = arith.addf %29, %35 : vector<128x8xf32>
    %c0_81 = arith.constant 0 : index
    %c0_82 = arith.constant 0 : index
    %c1_83 = arith.constant 1 : index
    %c0_84 = arith.constant 0 : index
    %37 = vector.load %arg9[%c0_81, %c0_82, %c1_83, %c0_84] : memref<2x10x10x2xf32, #tpu.memory_space<vmem>>, vector<2x8x8x2xf32>
    %38 = vector.shape_cast %37 : vector<2x8x8x2xf32> to vector<128x2xf32>
    %39 = arith.truncf %38 : vector<128x2xf32> to vector<128x2xbf16>
    %c1_85 = arith.constant 1 : index
    %c0_86 = arith.constant 0 : index
    %c0_87 = arith.constant 0 : index
    %40 = vector.load %arg3[%c1_85, %c0_86, %c0_87] : memref<9x2x8xbf16, #tpu.memory_space<vmem>>, vector<1x2x8xbf16>
    %41 = vector.shape_cast %40 : vector<1x2x8xbf16> to vector<2x8xbf16>
    %cst_88 = arith.constant dense<0.000000e+00> : vector<128x8xf32>
    %42 = tpu.matmul %39, %41, %cst_88 {dimension_numbers = #tpu.dot_dimension_numbers<[1], [0], [0], [1], [0, 0, 1, 1], [], []>} : vector<128x2xbf16>, vector<2x8xbf16>, vector<128x8xf32> -> vector<128x8xf32>
    %43 = arith.addf %36, %42 : vector<128x8xf32>
    %c0_89 = arith.constant 0 : index
    %c0_90 = arith.constant 0 : index
    %c2 = arith.constant 2 : index
    %c0_91 = arith.constant 0 : index
    %44 = vector.load %arg9[%c0_89, %c0_90, %c2, %c0_91] : memref<2x10x10x2xf32, #tpu.memory_space<vmem>>, vector<2x8x8x2xf32>
    %45 = vector.shape_cast %44 : vector<2x8x8x2xf32> to vector<128x2xf32>
    %46 = arith.truncf %45 : vector<128x2xf32> to vector<128x2xbf16>
    %c2_92 = arith.constant 2 : index
    %c0_93 = arith.constant 0 : index
    %c0_94 = arith.constant 0 : index
    %47 = vector.load %arg3[%c2_92, %c0_93, %c0_94] : memref<9x2x8xbf16, #tpu.memory_space<vmem>>, vector<1x2x8xbf16>
    %48 = vector.shape_cast %47 : vector<1x2x8xbf16> to vector<2x8xbf16>
    %cst_95 = arith.constant dense<0.000000e+00> : vector<128x8xf32>
    %49 = tpu.matmul %46, %48, %cst_95 {dimension_numbers = #tpu.dot_dimension_numbers<[1], [0], [0], [1], [0, 0, 1, 1], [], []>} : vector<128x2xbf16>, vector<2x8xbf16>, vector<128x8xf32> -> vector<128x8xf32>
    %50 = arith.addf %43, %49 : vector<128x8xf32>
    %c0_96 = arith.constant 0 : index
    %c1_97 = arith.constant 1 : index
    %c0_98 = arith.constant 0 : index
    %c0_99 = arith.constant 0 : index
    %51 = vector.load %arg9[%c0_96, %c1_97, %c0_98, %c0_99] : memref<2x10x10x2xf32, #tpu.memory_space<vmem>>, vector<2x8x8x2xf32>
    %52 = vector.shape_cast %51 : vector<2x8x8x2xf32> to vector<128x2xf32>
    %53 = arith.truncf %52 : vector<128x2xf32> to vector<128x2xbf16>
    %c3 = arith.constant 3 : index
    %c0_100 = arith.constant 0 : index
    %c0_101 = arith.constant 0 : index
    %54 = vector.load %arg3[%c3, %c0_100, %c0_101] : memref<9x2x8xbf16, #tpu.memory_space<vmem>>, vector<1x2x8xbf16>
    %55 = vector.shape_cast %54 : vector<1x2x8xbf16> to vector<2x8xbf16>
    %cst_102 = arith.constant dense<0.000000e+00> : vector<128x8xf32>
    %56 = tpu.matmul %53, %55, %cst_102 {dimension_numbers = #tpu.dot_dimension_numbers<[1], [0], [0], [1], [0, 0, 1, 1], [], []>} : vector<128x2xbf16>, vector<2x8xbf16>, vector<128x8xf32> -> vector<128x8xf32>
    %57 = arith.addf %50, %56 : vector<128x8xf32>
    %c0_103 = arith.constant 0 : index
    %c1_104 = arith.constant 1 : index
    %c1_105 = arith.constant 1 : index
    %c0_106 = arith.constant 0 : index
    %58 = vector.load %arg9[%c0_103, %c1_104, %c1_105, %c0_106] : memref<2x10x10x2xf32, #tpu.memory_space<vmem>>, vector<2x8x8x2xf32>
    %59 = vector.shape_cast %58 : vector<2x8x8x2xf32> to vector<128x2xf32>
    %60 = arith.truncf %59 : vector<128x2xf32> to vector<128x2xbf16>
    %c4 = arith.constant 4 : index
    %c0_107 = arith.constant 0 : index
    %c0_108 = arith.constant 0 : index
    %61 = vector.load %arg3[%c4, %c0_107, %c0_108] : memref<9x2x8xbf16, #tpu.memory_space<vmem>>, vector<1x2x8xbf16>
    %62 = vector.shape_cast %61 : vector<1x2x8xbf16> to vector<2x8xbf16>
    %cst_109 = arith.constant dense<0.000000e+00> : vector<128x8xf32>
    %63 = tpu.matmul %60, %62, %cst_109 {dimension_numbers = #tpu.dot_dimension_numbers<[1], [0], [0], [1], [0, 0, 1, 1], [], []>} : vector<128x2xbf16>, vector<2x8xbf16>, vector<128x8xf32> -> vector<128x8xf32>
    %64 = arith.addf %57, %63 : vector<128x8xf32>
    %c0_110 = arith.constant 0 : index
    %c1_111 = arith.constant 1 : index
    %c2_112 = arith.constant 2 : index
    %c0_113 = arith.constant 0 : index
    %65 = vector.load %arg9[%c0_110, %c1_111, %c2_112, %c0_113] : memref<2x10x10x2xf32, #tpu.memory_space<vmem>>, vector<2x8x8x2xf32>
    %66 = vector.shape_cast %65 : vector<2x8x8x2xf32> to vector<128x2xf32>
    %67 = arith.truncf %66 : vector<128x2xf32> to vector<128x2xbf16>
    %c5 = arith.constant 5 : index
    %c0_114 = arith.constant 0 : index
    %c0_115 = arith.constant 0 : index
    %68 = vector.load %arg3[%c5, %c0_114, %c0_115] : memref<9x2x8xbf16, #tpu.memory_space<vmem>>, vector<1x2x8xbf16>
    %69 = vector.shape_cast %68 : vector<1x2x8xbf16> to vector<2x8xbf16>
    %cst_116 = arith.constant dense<0.000000e+00> : vector<128x8xf32>
    %70 = tpu.matmul %67, %69, %cst_116 {dimension_numbers = #tpu.dot_dimension_numbers<[1], [0], [0], [1], [0, 0, 1, 1], [], []>} : vector<128x2xbf16>, vector<2x8xbf16>, vector<128x8xf32> -> vector<128x8xf32>
    %71 = arith.addf %64, %70 : vector<128x8xf32>
    %c0_117 = arith.constant 0 : index
    %c2_118 = arith.constant 2 : index
    %c0_119 = arith.constant 0 : index
    %c0_120 = arith.constant 0 : index
    %72 = vector.load %arg9[%c0_117, %c2_118, %c0_119, %c0_120] : memref<2x10x10x2xf32, #tpu.memory_space<vmem>>, vector<2x8x8x2xf32>
    %73 = vector.shape_cast %72 : vector<2x8x8x2xf32> to vector<128x2xf32>
    %74 = arith.truncf %73 : vector<128x2xf32> to vector<128x2xbf16>
    %c6 = arith.constant 6 : index
    %c0_121 = arith.constant 0 : index
    %c0_122 = arith.constant 0 : index
    %75 = vector.load %arg3[%c6, %c0_121, %c0_122] : memref<9x2x8xbf16, #tpu.memory_space<vmem>>, vector<1x2x8xbf16>
    %76 = vector.shape_cast %75 : vector<1x2x8xbf16> to vector<2x8xbf16>
    %cst_123 = arith.constant dense<0.000000e+00> : vector<128x8xf32>
    %77 = tpu.matmul %74, %76, %cst_123 {dimension_numbers = #tpu.dot_dimension_numbers<[1], [0], [0], [1], [0, 0, 1, 1], [], []>} : vector<128x2xbf16>, vector<2x8xbf16>, vector<128x8xf32> -> vector<128x8xf32>
    %78 = arith.addf %71, %77 : vector<128x8xf32>
    %c0_124 = arith.constant 0 : index
    %c2_125 = arith.constant 2 : index
    %c1_126 = arith.constant 1 : index
    %c0_127 = arith.constant 0 : index
    %79 = vector.load %arg9[%c0_124, %c2_125, %c1_126, %c0_127] : memref<2x10x10x2xf32, #tpu.memory_space<vmem>>, vector<2x8x8x2xf32>
    %80 = vector.shape_cast %79 : vector<2x8x8x2xf32> to vector<128x2xf32>
    %81 = arith.truncf %80 : vector<128x2xf32> to vector<128x2xbf16>
    %c7 = arith.constant 7 : index
    %c0_128 = arith.constant 0 : index
    %c0_129 = arith.constant 0 : index
    %82 = vector.load %arg3[%c7, %c0_128, %c0_129] : memref<9x2x8xbf16, #tpu.memory_space<vmem>>, vector<1x2x8xbf16>
    %83 = vector.shape_cast %82 : vector<1x2x8xbf16> to vector<2x8xbf16>
    %cst_130 = arith.constant dense<0.000000e+00> : vector<128x8xf32>
    %84 = tpu.matmul %81, %83, %cst_130 {dimension_numbers = #tpu.dot_dimension_numbers<[1], [0], [0], [1], [0, 0, 1, 1], [], []>} : vector<128x2xbf16>, vector<2x8xbf16>, vector<128x8xf32> -> vector<128x8xf32>
    %85 = arith.addf %78, %84 : vector<128x8xf32>
    %c0_131 = arith.constant 0 : index
    %c2_132 = arith.constant 2 : index
    %c2_133 = arith.constant 2 : index
    %c0_134 = arith.constant 0 : index
    %86 = vector.load %arg9[%c0_131, %c2_132, %c2_133, %c0_134] : memref<2x10x10x2xf32, #tpu.memory_space<vmem>>, vector<2x8x8x2xf32>
    %87 = vector.shape_cast %86 : vector<2x8x8x2xf32> to vector<128x2xf32>
    %88 = arith.truncf %87 : vector<128x2xf32> to vector<128x2xbf16>
    %c8 = arith.constant 8 : index
    %c0_135 = arith.constant 0 : index
    %c0_136 = arith.constant 0 : index
    %89 = vector.load %arg3[%c8, %c0_135, %c0_136] : memref<9x2x8xbf16, #tpu.memory_space<vmem>>, vector<1x2x8xbf16>
    %90 = vector.shape_cast %89 : vector<1x2x8xbf16> to vector<2x8xbf16>
    %cst_137 = arith.constant dense<0.000000e+00> : vector<128x8xf32>
    %91 = tpu.matmul %88, %90, %cst_137 {dimension_numbers = #tpu.dot_dimension_numbers<[1], [0], [0], [1], [0, 0, 1, 1], [], []>} : vector<128x2xbf16>, vector<2x8xbf16>, vector<128x8xf32> -> vector<128x8xf32>
    %92 = arith.addf %85, %91 : vector<128x8xf32>
    %c0_138 = arith.constant 0 : index
    %c0_139 = arith.constant 0 : index
    %c0_140 = arith.constant 0 : index
    %c0_141 = arith.constant 0 : index
    %93 = vector.load %arg10[%c0_138, %c0_139, %c0_140, %c0_141] : memref<2x10x10x2xf32, #tpu.memory_space<vmem>>, vector<2x8x8x2xf32>
    %94 = vector.shape_cast %93 : vector<2x8x8x2xf32> to vector<128x2xf32>
    %95 = arith.truncf %94 : vector<128x2xf32> to vector<128x2xbf16>
    %c0_142 = arith.constant 0 : index
    %c0_143 = arith.constant 0 : index
    %c0_144 = arith.constant 0 : index
    %96 = vector.load %arg4[%c0_142, %c0_143, %c0_144] : memref<9x2x8xbf16, #tpu.memory_space<vmem>>, vector<1x2x8xbf16>
    %97 = vector.shape_cast %96 : vector<1x2x8xbf16> to vector<2x8xbf16>
    %cst_145 = arith.constant dense<0.000000e+00> : vector<128x8xf32>
    %98 = tpu.matmul %95, %97, %cst_145 {dimension_numbers = #tpu.dot_dimension_numbers<[1], [0], [0], [1], [0, 0, 1, 1], [], []>} : vector<128x2xbf16>, vector<2x8xbf16>, vector<128x8xf32> -> vector<128x8xf32>
    %99 = arith.addf %92, %98 : vector<128x8xf32>
    %c0_146 = arith.constant 0 : index
    %c0_147 = arith.constant 0 : index
    %c1_148 = arith.constant 1 : index
    %c0_149 = arith.constant 0 : index
    %100 = vector.load %arg10[%c0_146, %c0_147, %c1_148, %c0_149] : memref<2x10x10x2xf32, #tpu.memory_space<vmem>>, vector<2x8x8x2xf32>
    %101 = vector.shape_cast %100 : vector<2x8x8x2xf32> to vector<128x2xf32>
    %102 = arith.truncf %101 : vector<128x2xf32> to vector<128x2xbf16>
    %c1_150 = arith.constant 1 : index
    %c0_151 = arith.constant 0 : index
    %c0_152 = arith.constant 0 : index
    %103 = vector.load %arg4[%c1_150, %c0_151, %c0_152] : memref<9x2x8xbf16, #tpu.memory_space<vmem>>, vector<1x2x8xbf16>
    %104 = vector.shape_cast %103 : vector<1x2x8xbf16> to vector<2x8xbf16>
    %cst_153 = arith.constant dense<0.000000e+00> : vector<128x8xf32>
    %105 = tpu.matmul %102, %104, %cst_153 {dimension_numbers = #tpu.dot_dimension_numbers<[1], [0], [0], [1], [0, 0, 1, 1], [], []>} : vector<128x2xbf16>, vector<2x8xbf16>, vector<128x8xf32> -> vector<128x8xf32>
    %106 = arith.addf %99, %105 : vector<128x8xf32>
    %c0_154 = arith.constant 0 : index
    %c0_155 = arith.constant 0 : index
    %c2_156 = arith.constant 2 : index
    %c0_157 = arith.constant 0 : index
    %107 = vector.load %arg10[%c0_154, %c0_155, %c2_156, %c0_157] : memref<2x10x10x2xf32, #tpu.memory_space<vmem>>, vector<2x8x8x2xf32>
    %108 = vector.shape_cast %107 : vector<2x8x8x2xf32> to vector<128x2xf32>
    %109 = arith.truncf %108 : vector<128x2xf32> to vector<128x2xbf16>
    %c2_158 = arith.constant 2 : index
    %c0_159 = arith.constant 0 : index
    %c0_160 = arith.constant 0 : index
    %110 = vector.load %arg4[%c2_158, %c0_159, %c0_160] : memref<9x2x8xbf16, #tpu.memory_space<vmem>>, vector<1x2x8xbf16>
    %111 = vector.shape_cast %110 : vector<1x2x8xbf16> to vector<2x8xbf16>
    %cst_161 = arith.constant dense<0.000000e+00> : vector<128x8xf32>
    %112 = tpu.matmul %109, %111, %cst_161 {dimension_numbers = #tpu.dot_dimension_numbers<[1], [0], [0], [1], [0, 0, 1, 1], [], []>} : vector<128x2xbf16>, vector<2x8xbf16>, vector<128x8xf32> -> vector<128x8xf32>
    %113 = arith.addf %106, %112 : vector<128x8xf32>
    %c0_162 = arith.constant 0 : index
    %c1_163 = arith.constant 1 : index
    %c0_164 = arith.constant 0 : index
    %c0_165 = arith.constant 0 : index
    %114 = vector.load %arg10[%c0_162, %c1_163, %c0_164, %c0_165] : memref<2x10x10x2xf32, #tpu.memory_space<vmem>>, vector<2x8x8x2xf32>
    %115 = vector.shape_cast %114 : vector<2x8x8x2xf32> to vector<128x2xf32>
    %116 = arith.truncf %115 : vector<128x2xf32> to vector<128x2xbf16>
    %c3_166 = arith.constant 3 : index
    %c0_167 = arith.constant 0 : index
    %c0_168 = arith.constant 0 : index
    %117 = vector.load %arg4[%c3_166, %c0_167, %c0_168] : memref<9x2x8xbf16, #tpu.memory_space<vmem>>, vector<1x2x8xbf16>
    %118 = vector.shape_cast %117 : vector<1x2x8xbf16> to vector<2x8xbf16>
    %cst_169 = arith.constant dense<0.000000e+00> : vector<128x8xf32>
    %119 = tpu.matmul %116, %118, %cst_169 {dimension_numbers = #tpu.dot_dimension_numbers<[1], [0], [0], [1], [0, 0, 1, 1], [], []>} : vector<128x2xbf16>, vector<2x8xbf16>, vector<128x8xf32> -> vector<128x8xf32>
    %120 = arith.addf %113, %119 : vector<128x8xf32>
    %c0_170 = arith.constant 0 : index
    %c1_171 = arith.constant 1 : index
    %c1_172 = arith.constant 1 : index
    %c0_173 = arith.constant 0 : index
    %121 = vector.load %arg10[%c0_170, %c1_171, %c1_172, %c0_173] : memref<2x10x10x2xf32, #tpu.memory_space<vmem>>, vector<2x8x8x2xf32>
    %122 = vector.shape_cast %121 : vector<2x8x8x2xf32> to vector<128x2xf32>
    %123 = arith.truncf %122 : vector<128x2xf32> to vector<128x2xbf16>
    %c4_174 = arith.constant 4 : index
    %c0_175 = arith.constant 0 : index
    %c0_176 = arith.constant 0 : index
    %124 = vector.load %arg4[%c4_174, %c0_175, %c0_176] : memref<9x2x8xbf16, #tpu.memory_space<vmem>>, vector<1x2x8xbf16>
    %125 = vector.shape_cast %124 : vector<1x2x8xbf16> to vector<2x8xbf16>
    %cst_177 = arith.constant dense<0.000000e+00> : vector<128x8xf32>
    %126 = tpu.matmul %123, %125, %cst_177 {dimension_numbers = #tpu.dot_dimension_numbers<[1], [0], [0], [1], [0, 0, 1, 1], [], []>} : vector<128x2xbf16>, vector<2x8xbf16>, vector<128x8xf32> -> vector<128x8xf32>
    %127 = arith.addf %120, %126 : vector<128x8xf32>
    %c0_178 = arith.constant 0 : index
    %c1_179 = arith.constant 1 : index
    %c2_180 = arith.constant 2 : index
    %c0_181 = arith.constant 0 : index
    %128 = vector.load %arg10[%c0_178, %c1_179, %c2_180, %c0_181] : memref<2x10x10x2xf32, #tpu.memory_space<vmem>>, vector<2x8x8x2xf32>
    %129 = vector.shape_cast %128 : vector<2x8x8x2xf32> to vector<128x2xf32>
    %130 = arith.truncf %129 : vector<128x2xf32> to vector<128x2xbf16>
    %c5_182 = arith.constant 5 : index
    %c0_183 = arith.constant 0 : index
    %c0_184 = arith.constant 0 : index
    %131 = vector.load %arg4[%c5_182, %c0_183, %c0_184] : memref<9x2x8xbf16, #tpu.memory_space<vmem>>, vector<1x2x8xbf16>
    %132 = vector.shape_cast %131 : vector<1x2x8xbf16> to vector<2x8xbf16>
    %cst_185 = arith.constant dense<0.000000e+00> : vector<128x8xf32>
    %133 = tpu.matmul %130, %132, %cst_185 {dimension_numbers = #tpu.dot_dimension_numbers<[1], [0], [0], [1], [0, 0, 1, 1], [], []>} : vector<128x2xbf16>, vector<2x8xbf16>, vector<128x8xf32> -> vector<128x8xf32>
    %134 = arith.addf %127, %133 : vector<128x8xf32>
    %c0_186 = arith.constant 0 : index
    %c2_187 = arith.constant 2 : index
    %c0_188 = arith.constant 0 : index
    %c0_189 = arith.constant 0 : index
    %135 = vector.load %arg10[%c0_186, %c2_187, %c0_188, %c0_189] : memref<2x10x10x2xf32, #tpu.memory_space<vmem>>, vector<2x8x8x2xf32>
    %136 = vector.shape_cast %135 : vector<2x8x8x2xf32> to vector<128x2xf32>
    %137 = arith.truncf %136 : vector<128x2xf32> to vector<128x2xbf16>
    %c6_190 = arith.constant 6 : index
    %c0_191 = arith.constant 0 : index
    %c0_192 = arith.constant 0 : index
    %138 = vector.load %arg4[%c6_190, %c0_191, %c0_192] : memref<9x2x8xbf16, #tpu.memory_space<vmem>>, vector<1x2x8xbf16>
    %139 = vector.shape_cast %138 : vector<1x2x8xbf16> to vector<2x8xbf16>
    %cst_193 = arith.constant dense<0.000000e+00> : vector<128x8xf32>
    %140 = tpu.matmul %137, %139, %cst_193 {dimension_numbers = #tpu.dot_dimension_numbers<[1], [0], [0], [1], [0, 0, 1, 1], [], []>} : vector<128x2xbf16>, vector<2x8xbf16>, vector<128x8xf32> -> vector<128x8xf32>
    %141 = arith.addf %134, %140 : vector<128x8xf32>
    %c0_194 = arith.constant 0 : index
    %c2_195 = arith.constant 2 : index
    %c1_196 = arith.constant 1 : index
    %c0_197 = arith.constant 0 : index
    %142 = vector.load %arg10[%c0_194, %c2_195, %c1_196, %c0_197] : memref<2x10x10x2xf32, #tpu.memory_space<vmem>>, vector<2x8x8x2xf32>
    %143 = vector.shape_cast %142 : vector<2x8x8x2xf32> to vector<128x2xf32>
    %144 = arith.truncf %143 : vector<128x2xf32> to vector<128x2xbf16>
    %c7_198 = arith.constant 7 : index
    %c0_199 = arith.constant 0 : index
    %c0_200 = arith.constant 0 : index
    %145 = vector.load %arg4[%c7_198, %c0_199, %c0_200] : memref<9x2x8xbf16, #tpu.memory_space<vmem>>, vector<1x2x8xbf16>
    %146 = vector.shape_cast %145 : vector<1x2x8xbf16> to vector<2x8xbf16>
    %cst_201 = arith.constant dense<0.000000e+00> : vector<128x8xf32>
    %147 = tpu.matmul %144, %146, %cst_201 {dimension_numbers = #tpu.dot_dimension_numbers<[1], [0], [0], [1], [0, 0, 1, 1], [], []>} : vector<128x2xbf16>, vector<2x8xbf16>, vector<128x8xf32> -> vector<128x8xf32>
    %148 = arith.addf %141, %147 : vector<128x8xf32>
    %c0_202 = arith.constant 0 : index
    %c2_203 = arith.constant 2 : index
    %c2_204 = arith.constant 2 : index
    %c0_205 = arith.constant 0 : index
    %149 = vector.load %arg10[%c0_202, %c2_203, %c2_204, %c0_205] : memref<2x10x10x2xf32, #tpu.memory_space<vmem>>, vector<2x8x8x2xf32>
    %150 = vector.shape_cast %149 : vector<2x8x8x2xf32> to vector<128x2xf32>
    %151 = arith.truncf %150 : vector<128x2xf32> to vector<128x2xbf16>
    %c8_206 = arith.constant 8 : index
    %c0_207 = arith.constant 0 : index
    %c0_208 = arith.constant 0 : index
    %152 = vector.load %arg4[%c8_206, %c0_207, %c0_208] : memref<9x2x8xbf16, #tpu.memory_space<vmem>>, vector<1x2x8xbf16>
    %153 = vector.shape_cast %152 : vector<1x2x8xbf16> to vector<2x8xbf16>
    %cst_209 = arith.constant dense<0.000000e+00> : vector<128x8xf32>
    %154 = tpu.matmul %151, %153, %cst_209 {dimension_numbers = #tpu.dot_dimension_numbers<[1], [0], [0], [1], [0, 0, 1, 1], [], []>} : vector<128x2xbf16>, vector<2x8xbf16>, vector<128x8xf32> -> vector<128x8xf32>
    %155 = arith.addf %148, %154 : vector<128x8xf32>
    %c0_210 = arith.constant 0 : index
    %c0_211 = arith.constant 0 : index
    %156 = vector.load %arg5[%c0_210, %c0_211] : memref<1x8xf32, #tpu.memory_space<vmem>>, vector<1x8xf32>
    %157 = vector.broadcast %156 : vector<1x8xf32> to vector<128x8xf32>
    %158 = arith.addf %155, %157 : vector<128x8xf32>
    %cst_212 = arith.constant 0.000000e+00 : f32
    %159 = vector.broadcast %cst_212 : f32 to vector<128x8xf32>
    %160 = arith.maximumf %158, %159 : vector<128x8xf32>
    %161 = vector.shape_cast %160 : vector<128x8xf32> to vector<2x8x8x8xf32>
    %c0_213 = arith.constant 0 : index
    %c1_214 = arith.constant 1 : index
    %c1_215 = arith.constant 1 : index
    %c0_216 = arith.constant 0 : index
    %162 = vector.load %arg11[%c0_213, %c1_214, %c1_215, %c0_216] : memref<2x10x10x8xf32, #tpu.memory_space<vmem>>, vector<2x8x8x8xf32>
    tpu.vector_store %arg11[%c0_213, %c1_214, %c1_215, %c0_216], %161 {strides = array<i32>} : memref<2x10x10x8xf32, #tpu.memory_space<vmem>>, vector<2x8x8x8xf32>,
    %cst_217 = arith.constant 0.000000e+00 : f32
    %163 = vector.broadcast %cst_217 : f32 to vector<128x8xf32>
    %c0_218 = arith.constant 0 : index
    %c0_219 = arith.constant 0 : index
    %c0_220 = arith.constant 0 : index
    %c0_221 = arith.constant 0 : index
    %164 = vector.load %arg11[%c0_218, %c0_219, %c0_220, %c0_221] : memref<2x10x10x8xf32, #tpu.memory_space<vmem>>, vector<2x8x8x8xf32>
    %165 = vector.shape_cast %164 : vector<2x8x8x8xf32> to vector<128x8xf32>
    %166 = arith.truncf %165 : vector<128x8xf32> to vector<128x8xbf16>
    %c0_222 = arith.constant 0 : index
    %c0_223 = arith.constant 0 : index
    %c0_224 = arith.constant 0 : index
    %167 = vector.load %arg6[%c0_222, %c0_223, %c0_224] : memref<9x8x8xbf16, #tpu.memory_space<vmem>>, vector<1x8x8xbf16>
    %168 = vector.shape_cast %167 : vector<1x8x8xbf16> to vector<8x8xbf16>
    %cst_225 = arith.constant dense<0.000000e+00> : vector<128x8xf32>
    %169 = tpu.matmul %166, %168, %cst_225 {dimension_numbers = #tpu.dot_dimension_numbers<[1], [0], [0], [1], [0, 0, 1, 1], [], []>} : vector<128x8xbf16>, vector<8x8xbf16>, vector<128x8xf32> -> vector<128x8xf32>
    %170 = arith.addf %163, %169 : vector<128x8xf32>
    %c0_226 = arith.constant 0 : index
    %c0_227 = arith.constant 0 : index
    %c1_228 = arith.constant 1 : index
    %c0_229 = arith.constant 0 : index
    %171 = vector.load %arg11[%c0_226, %c0_227, %c1_228, %c0_229] : memref<2x10x10x8xf32, #tpu.memory_space<vmem>>, vector<2x8x8x8xf32>
    %172 = vector.shape_cast %171 : vector<2x8x8x8xf32> to vector<128x8xf32>
    %173 = arith.truncf %172 : vector<128x8xf32> to vector<128x8xbf16>
    %c1_230 = arith.constant 1 : index
    %c0_231 = arith.constant 0 : index
    %c0_232 = arith.constant 0 : index
    %174 = vector.load %arg6[%c1_230, %c0_231, %c0_232] : memref<9x8x8xbf16, #tpu.memory_space<vmem>>, vector<1x8x8xbf16>
    %175 = vector.shape_cast %174 : vector<1x8x8xbf16> to vector<8x8xbf16>
    %cst_233 = arith.constant dense<0.000000e+00> : vector<128x8xf32>
    %176 = tpu.matmul %173, %175, %cst_233 {dimension_numbers = #tpu.dot_dimension_numbers<[1], [0], [0], [1], [0, 0, 1, 1], [], []>} : vector<128x8xbf16>, vector<8x8xbf16>, vector<128x8xf32> -> vector<128x8xf32>
    %177 = arith.addf %170, %176 : vector<128x8xf32>
    %c0_234 = arith.constant 0 : index
    %c0_235 = arith.constant 0 : index
    %c2_236 = arith.constant 2 : index
    %c0_237 = arith.constant 0 : index
    %178 = vector.load %arg11[%c0_234, %c0_235, %c2_236, %c0_237] : memref<2x10x10x8xf32, #tpu.memory_space<vmem>>, vector<2x8x8x8xf32>
    %179 = vector.shape_cast %178 : vector<2x8x8x8xf32> to vector<128x8xf32>
    %180 = arith.truncf %179 : vector<128x8xf32> to vector<128x8xbf16>
    %c2_238 = arith.constant 2 : index
    %c0_239 = arith.constant 0 : index
    %c0_240 = arith.constant 0 : index
    %181 = vector.load %arg6[%c2_238, %c0_239, %c0_240] : memref<9x8x8xbf16, #tpu.memory_space<vmem>>, vector<1x8x8xbf16>
    %182 = vector.shape_cast %181 : vector<1x8x8xbf16> to vector<8x8xbf16>
    %cst_241 = arith.constant dense<0.000000e+00> : vector<128x8xf32>
    %183 = tpu.matmul %180, %182, %cst_241 {dimension_numbers = #tpu.dot_dimension_numbers<[1], [0], [0], [1], [0, 0, 1, 1], [], []>} : vector<128x8xbf16>, vector<8x8xbf16>, vector<128x8xf32> -> vector<128x8xf32>
    %184 = arith.addf %177, %183 : vector<128x8xf32>
    %c0_242 = arith.constant 0 : index
    %c1_243 = arith.constant 1 : index
    %c0_244 = arith.constant 0 : index
    %c0_245 = arith.constant 0 : index
    %185 = vector.load %arg11[%c0_242, %c1_243, %c0_244, %c0_245] : memref<2x10x10x8xf32, #tpu.memory_space<vmem>>, vector<2x8x8x8xf32>
    %186 = vector.shape_cast %185 : vector<2x8x8x8xf32> to vector<128x8xf32>
    %187 = arith.truncf %186 : vector<128x8xf32> to vector<128x8xbf16>
    %c3_246 = arith.constant 3 : index
    %c0_247 = arith.constant 0 : index
    %c0_248 = arith.constant 0 : index
    %188 = vector.load %arg6[%c3_246, %c0_247, %c0_248] : memref<9x8x8xbf16, #tpu.memory_space<vmem>>, vector<1x8x8xbf16>
    %189 = vector.shape_cast %188 : vector<1x8x8xbf16> to vector<8x8xbf16>
    %cst_249 = arith.constant dense<0.000000e+00> : vector<128x8xf32>
    %190 = tpu.matmul %187, %189, %cst_249 {dimension_numbers = #tpu.dot_dimension_numbers<[1], [0], [0], [1], [0, 0, 1, 1], [], []>} : vector<128x8xbf16>, vector<8x8xbf16>, vector<128x8xf32> -> vector<128x8xf32>
    %191 = arith.addf %184, %190 : vector<128x8xf32>
    %c0_250 = arith.constant 0 : index
    %c1_251 = arith.constant 1 : index
    %c1_252 = arith.constant 1 : index
    %c0_253 = arith.constant 0 : index
    %192 = vector.load %arg11[%c0_250, %c1_251, %c1_252, %c0_253] : memref<2x10x10x8xf32, #tpu.memory_space<vmem>>, vector<2x8x8x8xf32>
    %193 = vector.shape_cast %192 : vector<2x8x8x8xf32> to vector<128x8xf32>
    %194 = arith.truncf %193 : vector<128x8xf32> to vector<128x8xbf16>
    %c4_254 = arith.constant 4 : index
    %c0_255 = arith.constant 0 : index
    %c0_256 = arith.constant 0 : index
    %195 = vector.load %arg6[%c4_254, %c0_255, %c0_256] : memref<9x8x8xbf16, #tpu.memory_space<vmem>>, vector<1x8x8xbf16>
    %196 = vector.shape_cast %195 : vector<1x8x8xbf16> to vector<8x8xbf16>
    %cst_257 = arith.constant dense<0.000000e+00> : vector<128x8xf32>
    %197 = tpu.matmul %194, %196, %cst_257 {dimension_numbers = #tpu.dot_dimension_numbers<[1], [0], [0], [1], [0, 0, 1, 1], [], []>} : vector<128x8xbf16>, vector<8x8xbf16>, vector<128x8xf32> -> vector<128x8xf32>
    %198 = arith.addf %191, %197 : vector<128x8xf32>
    %c0_258 = arith.constant 0 : index
    %c1_259 = arith.constant 1 : index
    %c2_260 = arith.constant 2 : index
    %c0_261 = arith.constant 0 : index
    %199 = vector.load %arg11[%c0_258, %c1_259, %c2_260, %c0_261] : memref<2x10x10x8xf32, #tpu.memory_space<vmem>>, vector<2x8x8x8xf32>
    %200 = vector.shape_cast %199 : vector<2x8x8x8xf32> to vector<128x8xf32>
    %201 = arith.truncf %200 : vector<128x8xf32> to vector<128x8xbf16>
    %c5_262 = arith.constant 5 : index
    %c0_263 = arith.constant 0 : index
    %c0_264 = arith.constant 0 : index
    %202 = vector.load %arg6[%c5_262, %c0_263, %c0_264] : memref<9x8x8xbf16, #tpu.memory_space<vmem>>, vector<1x8x8xbf16>
    %203 = vector.shape_cast %202 : vector<1x8x8xbf16> to vector<8x8xbf16>
    %cst_265 = arith.constant dense<0.000000e+00> : vector<128x8xf32>
    %204 = tpu.matmul %201, %203, %cst_265 {dimension_numbers = #tpu.dot_dimension_numbers<[1], [0], [0], [1], [0, 0, 1, 1], [], []>} : vector<128x8xbf16>, vector<8x8xbf16>, vector<128x8xf32> -> vector<128x8xf32>
    %205 = arith.addf %198, %204 : vector<128x8xf32>
    %c0_266 = arith.constant 0 : index
    %c2_267 = arith.constant 2 : index
    %c0_268 = arith.constant 0 : index
    %c0_269 = arith.constant 0 : index
    %206 = vector.load %arg11[%c0_266, %c2_267, %c0_268, %c0_269] : memref<2x10x10x8xf32, #tpu.memory_space<vmem>>, vector<2x8x8x8xf32>
    %207 = vector.shape_cast %206 : vector<2x8x8x8xf32> to vector<128x8xf32>
    %208 = arith.truncf %207 : vector<128x8xf32> to vector<128x8xbf16>
    %c6_270 = arith.constant 6 : index
    %c0_271 = arith.constant 0 : index
    %c0_272 = arith.constant 0 : index
    %209 = vector.load %arg6[%c6_270, %c0_271, %c0_272] : memref<9x8x8xbf16, #tpu.memory_space<vmem>>, vector<1x8x8xbf16>
    %210 = vector.shape_cast %209 : vector<1x8x8xbf16> to vector<8x8xbf16>
    %cst_273 = arith.constant dense<0.000000e+00> : vector<128x8xf32>
    %211 = tpu.matmul %208, %210, %cst_273 {dimension_numbers = #tpu.dot_dimension_numbers<[1], [0], [0], [1], [0, 0, 1, 1], [], []>} : vector<128x8xbf16>, vector<8x8xbf16>, vector<128x8xf32> -> vector<128x8xf32>
    %212 = arith.addf %205, %211 : vector<128x8xf32>
    %c0_274 = arith.constant 0 : index
    %c2_275 = arith.constant 2 : index
    %c1_276 = arith.constant 1 : index
    %c0_277 = arith.constant 0 : index
    %213 = vector.load %arg11[%c0_274, %c2_275, %c1_276, %c0_277] : memref<2x10x10x8xf32, #tpu.memory_space<vmem>>, vector<2x8x8x8xf32>
    %214 = vector.shape_cast %213 : vector<2x8x8x8xf32> to vector<128x8xf32>
    %215 = arith.truncf %214 : vector<128x8xf32> to vector<128x8xbf16>
    %c7_278 = arith.constant 7 : index
    %c0_279 = arith.constant 0 : index
    %c0_280 = arith.constant 0 : index
    %216 = vector.load %arg6[%c7_278, %c0_279, %c0_280] : memref<9x8x8xbf16, #tpu.memory_space<vmem>>, vector<1x8x8xbf16>
    %217 = vector.shape_cast %216 : vector<1x8x8xbf16> to vector<8x8xbf16>
    %cst_281 = arith.constant dense<0.000000e+00> : vector<128x8xf32>
    %218 = tpu.matmul %215, %217, %cst_281 {dimension_numbers = #tpu.dot_dimension_numbers<[1], [0], [0], [1], [0, 0, 1, 1], [], []>} : vector<128x8xbf16>, vector<8x8xbf16>, vector<128x8xf32> -> vector<128x8xf32>
    %219 = arith.addf %212, %218 : vector<128x8xf32>
    %c0_282 = arith.constant 0 : index
    %c2_283 = arith.constant 2 : index
    %c2_284 = arith.constant 2 : index
    %c0_285 = arith.constant 0 : index
    %220 = vector.load %arg11[%c0_282, %c2_283, %c2_284, %c0_285] : memref<2x10x10x8xf32, #tpu.memory_space<vmem>>, vector<2x8x8x8xf32>
    %221 = vector.shape_cast %220 : vector<2x8x8x8xf32> to vector<128x8xf32>
    %222 = arith.truncf %221 : vector<128x8xf32> to vector<128x8xbf16>
    %c8_286 = arith.constant 8 : index
    %c0_287 = arith.constant 0 : index
    %c0_288 = arith.constant 0 : index
    %223 = vector.load %arg6[%c8_286, %c0_287, %c0_288] : memref<9x8x8xbf16, #tpu.memory_space<vmem>>, vector<1x8x8xbf16>
    %224 = vector.shape_cast %223 : vector<1x8x8xbf16> to vector<8x8xbf16>
    %cst_289 = arith.constant dense<0.000000e+00> : vector<128x8xf32>
    %225 = tpu.matmul %222, %224, %cst_289 {dimension_numbers = #tpu.dot_dimension_numbers<[1], [0], [0], [1], [0, 0, 1, 1], [], []>} : vector<128x8xbf16>, vector<8x8xbf16>, vector<128x8xf32> -> vector<128x8xf32>
    %226 = arith.addf %219, %225 : vector<128x8xf32>
    %c0_290 = arith.constant 0 : index
    %c0_291 = arith.constant 0 : index
    %227 = vector.load %arg7[%c0_290, %c0_291] : memref<1x8xf32, #tpu.memory_space<vmem>>, vector<1x8xf32>
    %228 = vector.broadcast %227 : vector<1x8xf32> to vector<128x8xf32>
    %229 = arith.addf %226, %228 : vector<128x8xf32>
    %cst_292 = arith.constant 0.000000e+00 : f32
    %230 = vector.broadcast %cst_292 : f32 to vector<128x8xf32>
    %231 = arith.maximumf %229, %230 : vector<128x8xf32>
    %232 = vector.shape_cast %231 : vector<128x8xf32> to vector<2x64x8xf32>
    %c0_293 = arith.constant 0 : index
    %c0_294 = arith.constant 0 : index
    %c0_295 = arith.constant 0 : index
    %233 = vector.load %arg8[%c0_293, %c0_294, %c0_295] : memref<2x64x8xf32, #tpu.memory_space<vmem>>, vector<2x64x8xf32>
    tpu.vector_store %arg8[%c0_293, %c0_294, %c0_295], %232 {strides = array<i32>} : memref<2x64x8xf32, #tpu.memory_space<vmem>>, vector<2x64x8xf32>,
    return
  }
  func.func @transform_0(%arg0: i32) -> (i32, i32, i32, i32, i32) {
    %c0_i32 = arith.constant 0 : i32
    %c0_i32_0 = arith.constant 0 : i32
    %c0_i32_1 = arith.constant 0 : i32
    %c0_i32_2 = arith.constant 0 : i32
    %c0_i32_3 = arith.constant 0 : i32
    return %arg0, %c0_i32, %c0_i32_0, %c0_i32_1, %c0_i32_2 : i32, i32, i32, i32, i32
  }
  func.func @transform_1(%arg0: i32) -> (i32, i32, i32, i32) {
    %c0_i32 = arith.constant 0 : i32
    %c0_i32_0 = arith.constant 0 : i32
    %c0_i32_1 = arith.constant 0 : i32
    %c0_i32_2 = arith.constant 0 : i32
    return %arg0, %c0_i32, %c0_i32_0, %c0_i32_1 : i32, i32, i32, i32
  }
  func.func @transform_2(%arg0: i32) -> (i32, i32, i32) {
    %c0_i32 = arith.constant 0 : i32
    %c0_i32_0 = arith.constant 0 : i32
    %c0_i32_1 = arith.constant 0 : i32
    %c0_i32_2 = arith.constant 0 : i32
    return %c0_i32, %c0_i32_0, %c0_i32_1 : i32, i32, i32
  }
  func.func @transform_3(%arg0: i32) -> (i32, i32, i32) {
    %c0_i32 = arith.constant 0 : i32
    %c0_i32_0 = arith.constant 0 : i32
    %c0_i32_1 = arith.constant 0 : i32
    %c0_i32_2 = arith.constant 0 : i32
    return %c0_i32, %c0_i32_0, %c0_i32_1 : i32, i32, i32
  }
  func.func @transform_4(%arg0: i32) -> (i32, i32) {
    %c0_i32 = arith.constant 0 : i32
    %c0_i32_0 = arith.constant 0 : i32
    %c0_i32_1 = arith.constant 0 : i32
    return %c0_i32, %c0_i32_0 : i32, i32
  }
  func.func @transform_5(%arg0: i32) -> (i32, i32, i32) {
    %c0_i32 = arith.constant 0 : i32
    %c0_i32_0 = arith.constant 0 : i32
    %c0_i32_1 = arith.constant 0 : i32
    %c0_i32_2 = arith.constant 0 : i32
    return %c0_i32, %c0_i32_0, %c0_i32_1 : i32, i32, i32
  }
  func.func @transform_6(%arg0: i32) -> (i32, i32) {
    %c0_i32 = arith.constant 0 : i32
    %c0_i32_0 = arith.constant 0 : i32
    %c0_i32_1 = arith.constant 0 : i32
    return %c0_i32, %c0_i32_0 : i32, i32
  }
  func.func @transform_7(%arg0: i32) -> (i32, i32, i32) {
    %c0_i32 = arith.constant 0 : i32
    %c0_i32_0 = arith.constant 0 : i32
    %c0_i32_1 = arith.constant 0 : i32
    return %arg0, %c0_i32, %c0_i32_0 : i32, i32, i32
  }
}

</mosaic_0001>

<bundles_post_ra>
// kernel: tpu_custom_call.1
= control target key start
LH: loop header
LB: loop body
LE: loop exit
PB: predicated region body
PF: predicated region fallthrough
CT: control target
= control target key end

     0   :  { %vm27_vm0 = vcmask 15360   ;;  %vm29_vm1 = vcmask 9216   ;;  %vm38_vm2 = vcmask 8192   ;;  %v8110_v3 = vmov 0.0   ;;  %s6314_s17 = smov 126   ;;  %s8102_s0 = inlined_call_operand.vmem [shape: f32[2,8,2,8,4], index: 0, kind: input, shape index: {}]   ;;  %s8103_s2 = inlined_call_operand.vmem [shape: bf16[9,2,8], index: 2, kind: input, shape index: {}]   ;;  %s8104_s1 = inlined_call_operand.vmem [shape: f32[2,8,8,2], index: 1, kind: input, shape index: {}]   ;;  %s8105_s3 = inlined_call_operand.vmem [shape: bf16[9,2,8], index: 3, kind: input, shape index: {}]   ;;  %s8106_s5 = inlined_call_operand.vmem [shape: bf16[9,8,8], index: 5, kind: input, shape index: {}]   ;;  %s8107_s4 = inlined_call_operand.vmem [shape: f32[1,8], index: 4, kind: input, shape index: {}]   ;;  %s8108_s6 = inlined_call_operand.vmem [shape: f32[1,8], index: 6, kind: input, shape index: {}]   ;;  %s8109_s7 = inlined_call_operand.vmem [shape: f32[2,64,8], index: 7, kind: output, shape index: {}]  }
   0x1   :  { %v6358_v0 = vld [vmem:[%s8102_s0 + $0x20] sm:$0xff]  ;;  %v6363_v1 = vld [vmem:[%s8102_s0 + $0x28] sm:$0xff]  ;;  %28 = vst.msk [vmem:[#allocation2] sm:$0xff] %vm27_vm0, %v8110_v3  ;;  %31 = vst.msk [vmem:[#allocation2 + $0xa0] sm:$0xff] %vm27_vm0, %v8110_v3  ;;  %vm434_vm3 = vcmask 1040384   ;;  %vm128_vm4 = vcmask 64512  }
   0x2   :  { %v6368_v2 = vld [vmem:[%s8102_s0] sm:$0xff]  ;;  %30 = vst.msk [vmem:[#allocation2 + $0x8] sm:$0x3] %vm29_vm1, %v8110_v3  ;;  %32 = vst.msk [vmem:[#allocation2 + $0xa8] sm:$0x3] %vm29_vm1, %v8110_v3  ;;  %v6532_v4 = vmax.f32 %v6358_v0, %v6363_v1  ;;  %v4894_v5 = vld [vmem:[%s8102_s0 + $0x8] sm:$0xff] }
   0x3   :  { %34 = vst.msk [vmem:[#allocation2 + $0x90] sm:$0xff] %vm27_vm0, %v8110_v3  ;;  %36 = vst.msk [vmem:[#allocation2 + $0x130] sm:$0xff] %vm27_vm0, %v8110_v3  ;;  %v183_v6 = vld [vmem:[%s8102_s0 + $0x30] sm:$0xff]  ;;  %v4897_v7 = vld [vmem:[%s8102_s0 + $0x38] sm:$0xff]  ;;  %v6576_v8 = vmax.f32 %v6368_v2, %v4894_v5  ;;  %vm130_vm5 = vcmask 58368   ;;  %vm139_vm6 = vcmask 57344  }
   0x4   :  { %35 = vst.msk [vmem:[#allocation2 + $0x98] sm:$0x3] %vm29_vm1, %v8110_v3  ;;  %37 = vst.msk [vmem:[#allocation2 + $0x138] sm:$0x3] %vm29_vm1, %v8110_v3  ;;  %v181_v9 = vld [vmem:[%s8102_s0 + $0x10] sm:$0xff]  ;;  %v4895_v10 = vld [vmem:[%s8102_s0 + $0x18] sm:$0xff]  ;;  %249 = vrot.lane.b32.xlu1 %v6532_v4, %s6314_s17  ;;  %v6586_v11 = vmax.f32 %v183_v6, %v4897_v7 }
   0x5   :  { %40 = vst.msk [vmem:[#allocation2 + $0x10] sm:$0x1] %vm38_vm2, %v8110_v3  ;;  %41 = vst.msk [vmem:[#allocation2 + $0x20] sm:$0x1] %vm38_vm2, %v8110_v3  ;;  %245 = vrot.lane.b32.xlu0 %v6576_v8, %s6314_s17  ;;  %v6590_v12 = vmax.f32 %v181_v9, %v4895_v10  ;;  %v185_v13 = vld [vmem:[%s8102_s0 + $0x50] sm:$0xff]  ;;  %v4899_v14 = vld [vmem:[%s8102_s0 + $0x58] sm:$0xff] }
   0x6   :  { %42 = vst.msk [vmem:[#allocation2 + $0x30] sm:$0x1] %vm38_vm2, %v8110_v3  ;;  %43 = vst.msk [vmem:[#allocation2 + $0x40] sm:$0x1] %vm38_vm2, %v8110_v3  ;;  %v184_v15 = vld [vmem:[%s8102_s0 + $0x40] sm:$0xff]  ;;  %v4898_v16 = vld [vmem:[%s8102_s0 + $0x48] sm:$0xff]  ;;  %v6606_v17 = vmax.f32 %v185_v13, %v4899_v14 }
   0x7   :  { %44 = vst.msk [vmem:[#allocation2 + $0x50] sm:$0x1] %vm38_vm2, %v8110_v3  ;;  %45 = vst.msk [vmem:[#allocation2 + $0x60] sm:$0x1] %vm38_vm2, %v8110_v3  ;;  %v6610_v18 = vmax.f32 %v184_v15, %v4898_v16  ;;  %v187_v19 = vld [vmem:[%s8102_s0 + $0x70] sm:$0xff]  ;;  %v4901_v20 = vld [vmem:[%s8102_s0 + $0x78] sm:$0xff] }
   0x8   :  { %46 = vst.msk [vmem:[#allocation2 + $0x70] sm:$0x1] %vm38_vm2, %v8110_v3  ;;  %47 = vst.msk [vmem:[#allocation2 + $0x80] sm:$0x1] %vm38_vm2, %v8110_v3  ;;  %251 = vrot.lane.b32.xlu1 %v6586_v11, %s6314_s17  ;;  %v186_v21 = vld [vmem:[%s8102_s0 + $0x60] sm:$0xff]  ;;  %v4900_v22 = vld [vmem:[%s8102_s0 + $0x68] sm:$0xff]  ;;  %v6629_v24 = vmax.f32 %v187_v19, %v4901_v20 }
   0x9   :  { %50 = vst.msk [vmem:[#allocation2 + $0xb0] sm:$0x1] %vm38_vm2, %v8110_v3  ;;  %51 = vst.msk [vmem:[#allocation2 + $0xc0] sm:$0x1] %vm38_vm2, %v8110_v3  ;;  %247 = vrot.lane.b32.xlu0 %v6590_v12, %s6314_s17  ;;  %v4910_v23 = vld [vmem:[%s8103_s2 + $0x1] sm:$0x1]  ;;  %v6645_v28 = vmax.f32 %v186_v21, %v4900_v22 }
   0xa   :  { %52 = vst.msk [vmem:[#allocation2 + $0xd0] sm:$0x1] %vm38_vm2, %v8110_v3  ;;  %53 = vst.msk [vmem:[#allocation2 + $0xe0] sm:$0x1] %vm38_vm2, %v8110_v3  ;;  %6283 = vmatprep.subr.msk.bf16.mxu1 %vm434_vm3, %v4910_v23  ;;  %v6635_v25 = vld [vmem:[%s8103_s2 + $0x4] sm:$0x1] }
   0xb   :  { %54 = vst.msk [vmem:[#allocation2 + $0xf0] sm:$0x1] %vm38_vm2, %v8110_v3  ;;  %55 = vst.msk [vmem:[#allocation2 + $0x100] sm:$0x1] %vm38_vm2, %v8110_v3  ;;  %v436_v26 = vsel %vm434_vm3, %v4910_v23, 0  ;;  %v189_v29 = vld [vmem:[%s8102_s0 + $0x90] sm:$0xff]  ;;  %6287 = vmatprep.subr.msk.bf16.mxu0 %vm434_vm3, %v6635_v25 }
   0xc   :  { %56 = vst.msk [vmem:[#allocation2 + $0x110] sm:$0x1] %vm38_vm2, %v8110_v3  ;;  %57 = vst.msk [vmem:[#allocation2 + $0x120] sm:$0x1] %vm38_vm2, %v8110_v3  ;;  %255 = vrot.lane.b32.xlu1 %v6606_v17, %s6314_s17  ;;  %v6641_v27 = vld [vmem:[%s8103_s2 + $0x5] sm:$0x1]  ;;  %5396 = vmatpush3.bf16.msra.mxu1 %v436_v26 }
   0xd   :  { %60 = vst.msk [vmem:[#allocation2 + $0x19] sm:$0x1] %vm38_vm2, %v8110_v3  ;;  %61 = vst.msk [vmem:[#allocation2 + $0x29] sm:$0x1] %vm38_vm2, %v8110_v3  ;;  %253 = vrot.lane.b32.xlu0 %v6610_v18, %s6314_s17  ;;  %v4903_v30 = vld [vmem:[%s8102_s0 + $0x98] sm:$0xff]  ;;  %v6657_v31 = vsel %vm434_vm3, %v6635_v25, 0 }
   0xe   :  { %62 = vst.msk [vmem:[#allocation2 + $0x39] sm:$0x1] %vm38_vm2, %v8110_v3  ;;  %63 = vst.msk [vmem:[#allocation2 + $0x49] sm:$0x1] %vm38_vm2, %v8110_v3  ;;  %v188_v32 = vld [vmem:[%s8102_s0 + $0x80] sm:$0xff]  ;;  %v4902_v33 = vld [vmem:[%s8102_s0 + $0x88] sm:$0xff]  ;;  %5468 = vmatpush3.bf16.msra.mxu0 %v6657_v31  ;;  %v6670_v34 = vmax.f32 %v189_v29, %v4903_v30 }
   0xf   :  { %64 = vst.msk [vmem:[#allocation2 + $0x59] sm:$0x1] %vm38_vm2, %v8110_v3  ;;  %65 = vst.msk [vmem:[#allocation2 + $0x69] sm:$0x1] %vm38_vm2, %v8110_v3  ;;  %6289 = vmatprep.subr.msk.bf16.mxu0 %vm434_vm3, %v6641_v27  ;;  %v6674_v35 = vmax.f32 %v188_v32, %v4902_v33  ;;  %v191_v36 = vld [vmem:[%s8102_s0 + $0xb0] sm:$0xff]  ;;  %v4905_v37 = vld [vmem:[%s8102_s0 + $0xb8] sm:$0xff] }
  0x10   :  { %66 = vst.msk [vmem:[#allocation2 + $0x79] sm:$0x1] %vm38_vm2, %v8110_v3  ;;  %67 = vst.msk [vmem:[#allocation2 + $0x89] sm:$0x1] %vm38_vm2, %v8110_v3  ;;  %259 = vrot.lane.b32.xlu1 %v6629_v24, %s6314_s17  ;;  %v190_v38 = vld [vmem:[%s8102_s0 + $0xa0] sm:$0xff]  ;;  %v4904_v39 = vld [vmem:[%s8102_s0 + $0xa8] sm:$0xff]  ;;  %v6690_v40 = vmax.f32 %v191_v36, %v4905_v37 }
  0x11   :  { %70 = vst.msk [vmem:[#allocation2 + $0xb9] sm:$0x1] %vm38_vm2, %v8110_v3  ;;  %71 = vst.msk [vmem:[#allocation2 + $0xc9] sm:$0x1] %vm38_vm2, %v8110_v3  ;;  %257 = vrot.lane.b32.xlu0 %v6645_v28, %s6314_s17  ;;  %v6694_v41 = vmax.f32 %v190_v38, %v4904_v39  ;;  %v193_v42 = vld [vmem:[%s8102_s0 + $0xd0] sm:$0xff]  ;;  %v4907_v43 = vld [vmem:[%s8102_s0 + $0xd8] sm:$0xff] }
  0x12   :  { %72 = vst.msk [vmem:[#allocation2 + $0xd9] sm:$0x1] %vm38_vm2, %v8110_v3  ;;  %73 = vst.msk [vmem:[#allocation2 + $0xe9] sm:$0x1] %vm38_vm2, %v8110_v3  ;;  %v192_v44 = vld [vmem:[%s8102_s0 + $0xc0] sm:$0xff]  ;;  %v4906_v45 = vld [vmem:[%s8102_s0 + $0xc8] sm:$0xff]  ;;  %v6710_v46 = vmax.f32 %v193_v42, %v4907_v43 }
  0x13   :  { %74 = vst.msk [vmem:[#allocation2 + $0xf9] sm:$0x1] %vm38_vm2, %v8110_v3  ;;  %75 = vst.msk [vmem:[#allocation2 + $0x109] sm:$0x1] %vm38_vm2, %v8110_v3  ;;  %v6714_v47 = vmax.f32 %v192_v44, %v4906_v45  ;;  %v195_v48 = vld [vmem:[%s8102_s0 + $0xf0] sm:$0xff]  ;;  %v4909_v49 = vld [vmem:[%s8102_s0 + $0xf8] sm:$0xff] }
  0x14   :  { %76 = vst.msk [vmem:[#allocation2 + $0x119] sm:$0x1] %vm38_vm2, %v8110_v3  ;;  %77 = vst.msk [vmem:[#allocation2 + $0x129] sm:$0x1] %vm38_vm2, %v8110_v3  ;;  %263 = vrot.lane.b32.xlu1 %v6670_v34, %s6314_s17  ;;  %v194_v50 = vld [vmem:[%s8102_s0 + $0xe0] sm:$0xff]  ;;  %v4908_v51 = vld [vmem:[%s8102_s0 + $0xe8] sm:$0xff]  ;;  %v6730_v52 = vmax.f32 %v195_v48, %v4909_v49 }
  0x15   :  { %79 = vst.msk [vmem:[#allocation3] sm:$0xff] %vm27_vm0, %v8110_v3  ;;  %81 = vst.msk [vmem:[#allocation3 + $0xa0] sm:$0xff] %vm27_vm0, %v8110_v3  ;;  %261 = vrot.lane.b32.xlu0 %v6674_v35, %s6314_s17  ;;  %v6734_v53 = vmax.f32 %v194_v50, %v4908_v51  ;;  %v383_v54 = vld [vmem:[%s8103_s2] sm:$0x1]  ;;  %v384_v2 = vld [vmem:[#allocation2 + $0x1] sm:$0xff]  ;;  %v1208_v20 = vsel %vm434_vm3, %v6641_v27, 0 }
  0x16   :  { %80 = vst.msk [vmem:[#allocation3 + $0x8] sm:$0x3] %vm29_vm1, %v8110_v3  ;;  %82 = vst.msk [vmem:[#allocation3 + $0xa8] sm:$0x3] %vm29_vm1, %v8110_v3  ;;  %6284 = vmatprep.subr.msk.bf16.mxu1 %vm434_vm3, %v383_v54  ;;  %v6779_v26 = vld [vmem:[%s8103_s2 + $0x2] sm:$0x1] }
  0x17   :  { %84 = vst.msk [vmem:[#allocation3 + $0x90] sm:$0xff] %vm27_vm0, %v8110_v3  ;;  %86 = vst.msk [vmem:[#allocation3 + $0x130] sm:$0xff] %vm27_vm0, %v8110_v3  ;;  %v326_v42 = vld [vmem:[%s8104_s1] sm:$0xff]  ;;  %v327_v48 = vld [vmem:[%s8104_s1 + $0x8] sm:$0xff]  ;;  %vm3447_vm7 = vcmask 1043456  }
  0x18   :  { %85 = vst.msk [vmem:[#allocation3 + $0x98] sm:$0x3] %vm29_vm1, %v8110_v3  ;;  %87 = vst.msk [vmem:[#allocation3 + $0x138] sm:$0x3] %vm29_vm1, %v8110_v3  ;;  %267 = vrot.lane.b32.xlu1 %v6690_v40, %s6314_s17  ;;  %v328_v49 = vld [vmem:[%s8104_s1 + $0x10] sm:$0xff] }
  0x19   :  { %89 = vst.msk [vmem:[#allocation3 + $0x10] sm:$0x1] %vm38_vm2, %v8110_v3  ;;  %90 = vst.msk [vmem:[#allocation3 + $0x20] sm:$0x1] %vm38_vm2, %v8110_v3  ;;  %265 = vrot.lane.b32.xlu0 %v6694_v41, %s6314_s17 }
  0x1a   :  { %91 = vst.msk [vmem:[#allocation3 + $0x30] sm:$0x1] %vm38_vm2, %v8110_v3  ;;  %92 = vst.msk [vmem:[#allocation3 + $0x40] sm:$0x1] %vm38_vm2, %v8110_v3 }
  0x1b   :  { %93 = vst.msk [vmem:[#allocation3 + $0x50] sm:$0x1] %vm38_vm2, %v8110_v3  ;;  %94 = vst.msk [vmem:[#allocation3 + $0x60] sm:$0x1] %vm38_vm2, %v8110_v3 }
  0x1c   :  { %95 = vst.msk [vmem:[#allocation3 + $0x70] sm:$0x1] %vm38_vm2, %v8110_v3  ;;  %96 = vst.msk [vmem:[#allocation3 + $0x80] sm:$0x1] %vm38_vm2, %v8110_v3  ;;  %271 = vrot.lane.b32.xlu1 %v6710_v46, %s6314_s17 }
  0x1d   :  { %99 = vst.msk [vmem:[#allocation3 + $0xb0] sm:$0x1] %vm38_vm2, %v8110_v3  ;;  %100 = vst.msk [vmem:[#allocation3 + $0xc0] sm:$0x1] %vm38_vm2, %v8110_v3  ;;  %269 = vrot.lane.b32.xlu0 %v6714_v47, %s6314_s17 }
  0x1e   :  { %101 = vst.msk [vmem:[#allocation3 + $0xd0] sm:$0x1] %vm38_vm2, %v8110_v3  ;;  %102 = vst.msk [vmem:[#allocation3 + $0xe0] sm:$0x1] %vm38_vm2, %v8110_v3 }
  0x1f   :  { %103 = vst.msk [vmem:[#allocation3 + $0xf0] sm:$0x1] %vm38_vm2, %v8110_v3  ;;  %104 = vst.msk [vmem:[#allocation3 + $0x100] sm:$0x1] %vm38_vm2, %v8110_v3 }
  0x20   :  { %105 = vst.msk [vmem:[#allocation3 + $0x110] sm:$0x1] %vm38_vm2, %v8110_v3  ;;  %106 = vst.msk [vmem:[#allocation3 + $0x120] sm:$0x1] %vm38_vm2, %v8110_v3  ;;  %275 = vrot.lane.b32.xlu1 %v6730_v52, %s6314_s17 }
  0x21   :  { %109 = vst.msk [vmem:[#allocation3 + $0x19] sm:$0x1] %vm38_vm2, %v8110_v3  ;;  %110 = vst.msk [vmem:[#allocation3 + $0x29] sm:$0x1] %vm38_vm2, %v8110_v3  ;;  %273 = vrot.lane.b32.xlu0 %v6734_v53, %s6314_s17 }
  0x22   :  { %111 = vst.msk [vmem:[#allocation3 + $0x39] sm:$0x1] %vm38_vm2, %v8110_v3  ;;  %112 = vst.msk [vmem:[#allocation3 + $0x49] sm:$0x1] %vm38_vm2, %v8110_v3 }
  0x23   :  { %113 = vst.msk [vmem:[#allocation3 + $0x59] sm:$0x1] %vm38_vm2, %v8110_v3  ;;  %114 = vst.msk [vmem:[#allocation3 + $0x69] sm:$0x1] %vm38_vm2, %v8110_v3 }
  0x24   :  { %115 = vst.msk [vmem:[#allocation3 + $0x79] sm:$0x1] %vm38_vm2, %v8110_v3  ;;  %116 = vst.msk [vmem:[#allocation3 + $0x89] sm:$0x1] %vm38_vm2, %v8110_v3 }
  0x25   :  { %119 = vst.msk [vmem:[#allocation3 + $0xb9] sm:$0x1] %vm38_vm2, %v8110_v3  ;;  %120 = vst.msk [vmem:[#allocation3 + $0xc9] sm:$0x1] %vm38_vm2, %v8110_v3 }
  0x26   :  { %121 = vst.msk [vmem:[#allocation3 + $0xd9] sm:$0x1] %vm38_vm2, %v8110_v3  ;;  %122 = vst.msk [vmem:[#allocation3 + $0xe9] sm:$0x1] %vm38_vm2, %v8110_v3 }
  0x27   :  { %123 = vst.msk [vmem:[#allocation3 + $0xf9] sm:$0x1] %vm38_vm2, %v8110_v3  ;;  %124 = vst.msk [vmem:[#allocation3 + $0x109] sm:$0x1] %vm38_vm2, %v8110_v3 }
  0x28   :  { %125 = vst.msk [vmem:[#allocation3 + $0x119] sm:$0x1] %vm38_vm2, %v8110_v3  ;;  %126 = vst.msk [vmem:[#allocation3 + $0x129] sm:$0x1] %vm38_vm2, %v8110_v3 }
  0x29   :  { %39 = vst.msk [vmem:[#allocation2] sm:$0x1] %vm38_vm2, %v8110_v3  ;;  %59 = vst.msk [vmem:[#allocation2 + $0x9] sm:$0x1] %vm38_vm2, %v8110_v3 }
  0x2a   :  { %48 = vst.msk [vmem:[#allocation2 + $0x90] sm:$0x1] %vm38_vm2, %v8110_v3  ;;  %49 = vst.msk [vmem:[#allocation2 + $0xa0] sm:$0x1] %vm38_vm2, %v8110_v3 }
  0x2b   :  { %58 = vst.msk [vmem:[#allocation2 + $0x130] sm:$0x1] %vm38_vm2, %v8110_v3  ;;  %68 = vst.msk [vmem:[#allocation2 + $0x99] sm:$0x1] %vm38_vm2, %v8110_v3 }
  0x2c   :  { %69 = vst.msk [vmem:[#allocation2 + $0xa9] sm:$0x1] %vm38_vm2, %v8110_v3  ;;  %78 = vst.msk [vmem:[#allocation2 + $0x139] sm:$0x1] %vm38_vm2, %v8110_v3 }
  0x2d   :  { %88 = vst.msk [vmem:[#allocation3] sm:$0x1] %vm38_vm2, %v8110_v3  ;;  %97 = vst.msk [vmem:[#allocation3 + $0x90] sm:$0x1] %vm38_vm2, %v8110_v3 }
  0x2e   :  { %98 = vst.msk [vmem:[#allocation3 + $0xa0] sm:$0x1] %vm38_vm2, %v8110_v3  ;;  %107 = vst.msk [vmem:[#allocation3 + $0x130] sm:$0x1] %vm38_vm2, %v8110_v3 }
  0x2f   :  { %108 = vst.msk [vmem:[#allocation3 + $0x9] sm:$0x1] %vm38_vm2, %v8110_v3  ;;  %117 = vst.msk [vmem:[#allocation3 + $0x99] sm:$0x1] %vm38_vm2, %v8110_v3 }
  0x30   :  { %118 = vst.msk [vmem:[#allocation3 + $0xa9] sm:$0x1] %vm38_vm2, %v8110_v3  ;;  %127 = vst.msk [vmem:[#allocation3 + $0x139] sm:$0x1] %vm38_vm2, %v8110_v3 }
  0x31   :  { %343 = vst.msk [vmem:[#allocation3 + $0x11] sm:$0xff] %vm27_vm0, %v326_v42  ;;  %344 = vst.msk [vmem:[#allocation3 + $0x21] sm:$0xff] %vm27_vm0, %v327_v48 }
  0x32   :  { %345 = vst.msk [vmem:[#allocation3 + $0x31] sm:$0xff] %vm27_vm0, %v328_v49 }
  0x76   :  { %v250_v55 = vpop.permute.xlu1 %249 }
  0x77   :  { %v295_v56 = vmax.f32 %v6532_v4, %v250_v55  ;;  %v246_v57 = vpop.permute.xlu0 %245 }
  0x78   :  { %v293_v58 = vmax.f32 %v6576_v8, %v246_v57 }
  0x79   :  { %312 = vst.msk [vmem:[#allocation2 + $0x31] sm:$0xff] %vm27_vm0, %v295_v56 }
  0x7a   :  { %310 = vst.msk [vmem:[#allocation2 + $0x11] sm:$0xff] %vm27_vm0, %v293_v58  ;;  %v252_v59 = vpop.permute.xlu1 %251 }
  0x7b   :  { %v296_v60 = vmax.f32 %v6586_v11, %v252_v59  ;;  %v248_v61 = vpop.permute.xlu0 %247 }
  0x7c   :  { %v294_v62 = vmax.f32 %v6590_v12, %v248_v61 }
  0x7d   :  { %313 = vst.msk [vmem:[#allocation2 + $0x41] sm:$0xff] %vm27_vm0, %v296_v60 }
  0x7e   :  { %311 = vst.msk [vmem:[#allocation2 + $0x21] sm:$0xff] %vm27_vm0, %v294_v62  ;;  %v256_v63 = vpop.permute.xlu1 %255 }
  0x7f   :  { %v254_v0 = vpop.permute.xlu0 %253  ;;  %v298_v1 = vmax.f32 %v6606_v17, %v256_v63 }
  0x80   :  { %v297_v4 = vmax.f32 %v6610_v18, %v254_v0  ;;  %v387_v11 = vld [vmem:[#allocation2 + $0x31] sm:$0xff]  ;;  %v560_v18 = vsel %vm434_vm3, %v383_v54, 0 }
  0x81   :  { %315 = vst.msk [vmem:[#allocation2 + $0x61] sm:$0xff] %vm27_vm0, %v298_v1  ;;  %v385_v5 = vld [vmem:[#allocation2 + $0x11] sm:$0xff] }
  0x82   :  { %314 = vst.msk [vmem:[#allocation2 + $0x51] sm:$0xff] %vm27_vm0, %v297_v4  ;;  %v260_v6 = vpop.permute.xlu1 %259  ;;  %v400_v7 = vpack.c.bf16 %v385_v5, %v384_v2  ;;  %v6807_v44 = vld [vmem:[#allocation2 + $0x12] sm:$0xff]  ;;  %v330_v2 = vld [vmem:[%s8104_s1 + $0x20] sm:$0xff] }
  0x83   :  { %v258_v8 = vpop.permute.xlu0 %257  ;;  %v300_v9 = vmax.f32 %v6629_v24, %v260_v6  ;;  %v6774_v24 = vld [vmem:[%s8103_s2 + $0x6] sm:$0x1]  ;;  %v6838_v60 = vld [vmem:[#allocation2 + $0x32] sm:$0xff]  ;;  %347 = vst.msk [vmem:[#allocation3 + $0x51] sm:$0xff] %vm27_vm0, %v330_v2 }
  0x84   :  { %v299_v10 = vmax.f32 %v6645_v28, %v258_v8  ;;  %5397 = vmatprep.mubr.msk.bf16.mxu1 %vm27_vm0, %v400_v7  ;;  %v994_v12 = vld [vmem:[#allocation2 + $0x41] sm:$0xff]  ;;  %v329_v1 = vld [vmem:[%s8104_s1 + $0x18] sm:$0xff]  ;;  %v6951_v42 = vld [vmem:[#allocation2 + $0x30] sm:$0xff] }
  0x85   :  { %317 = vst.msk [vmem:[#allocation2 + $0x81] sm:$0xff] %vm27_vm0, %v300_v9  ;;  %v386_v13 = vld [vmem:[#allocation2 + $0x21] sm:$0xff]  ;;  %v1008_v14 = vpack.c.bf16 %v994_v12, %v387_v11  ;;  %346 = vst.msk [vmem:[#allocation3 + $0x41] sm:$0xff] %vm27_vm0, %v329_v1  ;;  %v340_v1 = vld [vmem:[%s8104_s1 + $0x70] sm:$0xff] }
  0x86   :  { %316 = vst.msk [vmem:[#allocation2 + $0x71] sm:$0xff] %vm27_vm0, %v299_v10  ;;  %v6761_v15 = vpack.c.bf16 %v387_v11, %v386_v13  ;;  %v1007_v16 = vpack.c.bf16 %v386_v13, %v385_v5  ;;  %v264_v17 = vpop.permute.xlu1 %263  ;;  %v6798_v37 = vld [vmem:[#allocation2 + $0x22] sm:$0xff]  ;;  %v1375_v5 = vsel %vm434_vm3, %v6774_v24, 0  ;;  %v332_v13 = vld [vmem:[%s8104_s1 + $0x30] sm:$0xff]  ;;  %357 = vst.msk [vmem:[#allocation3 + $0x111] sm:$0xff] %vm27_vm0, %v340_v1 }
  0x87   :  { %v262_v19 = vpop.permute.xlu0 %261  ;;  %v302_v21 = vmax.f32 %v6670_v34, %v264_v17  ;;  %v1173_v51 = vpack.c.bf16 %v6798_v37, %v6807_v44  ;;  %v6840_v61 = vld [vmem:[#allocation2 + $0x42] sm:$0xff]  ;;  %349 = vst.msk [vmem:[#allocation3 + $0x71] sm:$0xff] %vm27_vm0, %v332_v13 }
  0x88   :  { %v301_v22 = vmax.f32 %v6674_v35, %v262_v19  ;;  %5398 = vmatmul.mubr.msk.bf16.vlgmr.msra.gmra.mrb[0].mxu1 %vm27_vm0, %v6761_v15  ;;  %5469 = vmatprep.mubr.msk.bf16.mxu0 %vm27_vm0, %v1007_v16  ;;  %v996_v23 = vld [vmem:[#allocation2 + $0x61] sm:$0xff]  ;;  %v1174_v4 = vpack.c.bf16 %v6840_v61, %v6838_v60  ;;  %v6907_v19 = vld [vmem:[#allocation2 + $0x10] sm:$0xff] }
  0x89   :  { %5470 = vmatmul.mubr.msk.bf16.vlgmr.msra.gmra.mrb[0].mxu0 %vm27_vm0, %v1008_v14  ;;  %319 = vst.msk [vmem:[#allocation2 + $0xc1] sm:$0xff] %vm27_vm0, %v302_v21  ;;  %v389_v27 = vld [vmem:[#allocation2 + $0x51] sm:$0xff]  ;;  %5414 = vmatpush3.bf16.msra.mxu1 %v560_v18  ;;  %v6846_v0 = vld [vmem:[#allocation2 + $0x62] sm:$0xff] }
  0x8a   :  { %318 = vst.msk [vmem:[#allocation2 + $0xb1] sm:$0xff] %vm27_vm0, %v301_v22  ;;  %5486 = vmatpush3.bf16.msra.mxu0 %v1208_v20  ;;  %v6784_v28 = vpack.c.bf16 %v389_v27, %v994_v12  ;;  %v1009_v29 = vpack.c.bf16 %v996_v23, %v389_v27  ;;  %v268_v30 = vpop.permute.xlu1 %267  ;;  %6285 = vmatprep.subr.msk.bf16.mxu1 %vm434_vm3, %v6779_v26  ;;  %v6844_v63 = vld [vmem:[#allocation2 + $0x52] sm:$0xff]  ;;  %v331_v7 = vld [vmem:[%s8104_s1 + $0x28] sm:$0xff]  ;;  %v6880_v9 = vld [vmem:[%s8103_s2 + $0x7] sm:$0x1] }
  0x8b   :  { %v266_v32 = vpop.permute.xlu0 %265  ;;  %v304_v33 = vmax.f32 %v6690_v40, %v268_v30  ;;  %6290 = vmatprep.subr.msk.bf16.mxu0 %vm434_vm3, %v6774_v24  ;;  %v1175_v8 = vpack.c.bf16 %v6846_v0, %v6844_v63  ;;  %348 = vst.msk [vmem:[#allocation3 + $0x61] sm:$0xff] %vm27_vm0, %v331_v7  ;;  %v359_v14 = vld [vmem:[#allocation2] sm:$0xff] }
  0x8c   :  { %v303_v34 = vmax.f32 %v6694_v41, %v266_v32  ;;  %5401 = vmatprep.mubr.msk.bf16.mxu1 %vm27_vm0, %v6784_v28  ;;  %5473 = vmatprep.mubr.msk.bf16.mxu0 %vm27_vm0, %v1009_v29  ;;  %v6795_v35 = vld [vmem:[#allocation2 + $0x81] sm:$0xff]  ;;  %v375_v29 = vpack.c.bf16 %v6907_v19, %v359_v14 }
  0x8d   :  { %321 = vst.msk [vmem:[#allocation2 + $0xe1] sm:$0xff] %vm27_vm0, %v304_v33  ;;  %v391_v36 = vld [vmem:[#allocation2 + $0x71] sm:$0xff]  ;;  %v392_v41 = vld [vmem:[#allocation2 + $0xa1] sm:$0xff] }
  0x8e   :  { %320 = vst.msk [vmem:[#allocation2 + $0xd1] sm:$0xff] %vm27_vm0, %v303_v34  ;;  %v6801_v38 = vpack.c.bf16 %v391_v36, %v996_v23  ;;  %v1010_v39 = vpack.c.bf16 %v6795_v35, %v391_v36  ;;  %v272_v40 = vpop.permute.xlu1 %271  ;;  %v6909_v20 = vld [vmem:[#allocation2 + $0x72] sm:$0xff]  ;;  %v6911_v21 = vld [vmem:[#allocation2 + $0x82] sm:$0xff] }
  0x8f   :  { %v270_v43 = vpop.permute.xlu0 %269  ;;  %v306_v45 = vmax.f32 %v6710_v46, %v272_v40  ;;  %v334_v27 = vld [vmem:[%s8104_s1 + $0x40] sm:$0xff]  ;;  %v1176_v30 = vpack.c.bf16 %v6911_v21, %v6909_v20  ;;  %v335_v32 = vld [vmem:[%s8104_s1 + $0x48] sm:$0xff]  ;;  %v336_v33 = vld [vmem:[%s8104_s1 + $0x50] sm:$0xff] }
  0x90   :  { %v305_v50 = vmax.f32 %v6714_v47, %v270_v43  ;;  %5402 = vmatmul.mubr.msk.bf16.gmra.mrb[4].mxu1 %vm27_vm0, %v6801_v38  ;;  %v6831_v54 = vld [vmem:[#allocation2 + $0xc1] sm:$0xff]  ;;  %351 = vst.msk [vmem:[#allocation3 + $0xb1] sm:$0xff] %vm27_vm0, %v334_v27  ;;  %352 = vst.msk [vmem:[#allocation3 + $0xc1] sm:$0xff] %vm27_vm0, %v335_v32  ;;  %v6947_v40 = vld [vmem:[#allocation2 + $0x50] sm:$0xff] }
  0x91   :  { %5474 = vmatmul.mubr.msk.bf16.gmra.mrb[4].mxu0 %vm27_vm0, %v1010_v39  ;;  %323 = vst.msk [vmem:[#allocation2 + $0x101] sm:$0xff] %vm27_vm0, %v306_v45  ;;  %v6826_v46 = vld [vmem:[#allocation2 + $0xb1] sm:$0xff]  ;;  %v6898_v17 = vld [vmem:[#allocation2 + $0xc2] sm:$0xff]  ;;  %353 = vst.msk [vmem:[#allocation3 + $0xd1] sm:$0xff] %vm27_vm0, %v336_v33 }
  0x92   :  { %322 = vst.msk [vmem:[#allocation2 + $0xf1] sm:$0xff] %vm27_vm0, %v305_v50  ;;  %5487 = vmatprep.mubr.msk.bf16.mxu0 %vm27_vm0, %v1173_v51  ;;  %v404_v47 = vpack.c.bf16 %v6826_v46, %v392_v41  ;;  %v276_v55 = vpop.permute.xlu1 %275  ;;  %v1011_v58 = vpack.c.bf16 %v6831_v54, %v6826_v46  ;;  %v6896_v16 = vld [vmem:[#allocation2 + $0xb2] sm:$0xff]  ;;  %v6943_v36 = vld [vmem:[#allocation2 + $0x20] sm:$0xff] }
  0x93   :  { %v274_v56 = vpop.permute.xlu0 %273  ;;  %v308_v57 = vmax.f32 %v6730_v52, %v276_v55  ;;  %v1177_v24 = vpack.c.bf16 %v6898_v17, %v6896_v16  ;;  %v376_v48 = vpack.c.bf16 %v6951_v42, %v6943_v36  ;;  %v6959_v49 = vld [vmem:[#allocation2 + $0x40] sm:$0xff]  ;;  %v337_v51 = vld [vmem:[%s8104_s1 + $0x58] sm:$0xff]  ;;  %v6992_v2 = vld [vmem:[#allocation2 + $0x70] sm:$0xff] }
  0x94   :  { %v307_v59 = vmax.f32 %v6734_v53, %v274_v56  ;;  %5405 = vmatprep.mubr.msk.bf16.mxu1 %vm27_vm0, %v404_v47  ;;  %v6854_v53 = vld [vmem:[#allocation2 + $0xe1] sm:$0xff]  ;;  %v377_v55 = vpack.c.bf16 %v6947_v40, %v6959_v49  ;;  %v710_v56 = vsel %vm434_vm3, %v6779_v26, 0  ;;  %354 = vst.msk [vmem:[#allocation3 + $0xe1] sm:$0xff] %vm27_vm0, %v337_v51 }
  0x95   :  { %v6842_v62 = vld [vmem:[#allocation2 + $0xd1] sm:$0xff]  ;;  %325 = vst.msk [vmem:[#allocation2 + $0x121] sm:$0xff] %vm27_vm0, %v308_v57  ;;  %v6941_v34 = vld [vmem:[#allocation2 + $0xe2] sm:$0xff] }
  0x96   :  { %324 = vst.msk [vmem:[#allocation2 + $0x111] sm:$0xff] %vm27_vm0, %v307_v59  ;;  %v6852_v52 = vpack.c.bf16 %v6842_v62, %v6831_v54  ;;  %v1012_v6 = vpack.c.bf16 %v6854_v53, %v6842_v62  ;;  %v6949_v41 = vld [vmem:[#allocation2 + $0xd2] sm:$0xff]  ;;  %v338_v47 = vld [vmem:[%s8104_s1 + $0x60] sm:$0xff]  ;;  %v339_v57 = vld [vmem:[%s8104_s1 + $0x68] sm:$0xff] }
  0x97   :  { %v1178_v43 = vpack.c.bf16 %v6941_v34, %v6949_v41  ;;  %355 = vst.msk [vmem:[#allocation3 + $0xf1] sm:$0xff] %vm27_vm0, %v338_v47  ;;  %v4936_v59 = vld [vmem:[%s8103_s2 + $0x3] sm:$0x1]  ;;  %356 = vst.msk [vmem:[#allocation3 + $0x101] sm:$0xff] %vm27_vm0, %v339_v57  ;;  %v1331_v57 = vld [vmem:[#allocation2 + $0x90] sm:$0xff] }
  0x98   :  { %5406 = vmatmul.mubr.msk.bf16.gmra.mrb[8].mxu1 %vm27_vm0, %v6852_v52  ;;  %v6891_v12 = vld [vmem:[#allocation2 + $0x101] sm:$0xff]  ;;  %v7145_v54 = vld [vmem:[#allocation3 + $0x10] sm:$0xff] }
  0x99   :  { %5488 = vmatmul.mubr.msk.bf16.vlgmr.msra.gmra.mrb[0].mxu0 %vm27_vm0, %v1174_v4  ;;  %v6884_v10 = vld [vmem:[#allocation2 + $0xf1] sm:$0xff]  ;;  %v6945_v39 = vld [vmem:[#allocation2 + $0x102] sm:$0xff] }
  0x9a   :  { %5504 = vmatpush3.bf16.msra.mxu0 %v1375_v5  ;;  %5491 = vmatprep.mubr.msk.bf16.mxu0 %vm27_vm0, %v1175_v8  ;;  %v6889_v11 = vpack.c.bf16 %v6884_v10, %v6854_v53  ;;  %v1013_v18 = vpack.c.bf16 %v6891_v12, %v6884_v10  ;;  %v6955_v45 = vld [vmem:[#allocation2 + $0xf2] sm:$0xff]  ;;  %v367_v4 = vld [vmem:[#allocation2 + $0xa0] sm:$0xff] }
  0x9b   :  { %6291 = vmatprep.subr.msk.bf16.mxu0 %vm434_vm3, %v6880_v9  ;;  %v1179_v50 = vpack.c.bf16 %v6945_v39, %v6955_v45  ;;  %v6995_v5 = vld [vmem:[#allocation2 + $0xb0] sm:$0xff]  ;;  %v6999_v8 = vld [vmem:[#allocation2 + $0x60] sm:$0xff] }
  0x9c   :  { %5409 = vmatprep.mubr.msk.bf16.mxu1 %vm27_vm0, %v6889_v11  ;;  %v6990_v26 = vld [vmem:[#allocation2 + $0x122] sm:$0xff]  ;;  %v378_v14 = vpack.c.bf16 %v6992_v2, %v6999_v8  ;;  %v7016_v32 = vld [vmem:[#allocation2 + $0xf0] sm:$0xff] }
  0x9d   :  { %v6913_v22 = vld [vmem:[#allocation2 + $0x111] sm:$0xff]  ;;  %v7010_v27 = vld [vmem:[#allocation2 + $0xc0] sm:$0xff] }
  0x9e   :  { %v6917_v23 = vpack.c.bf16 %v6913_v22, %v6891_v12  ;;  %v6997_v7 = vld [vmem:[#allocation2 + $0x112] sm:$0xff]  ;;  %v7031_v51 = vld [vmem:[#allocation2 + $0x100] sm:$0xff] }
  0x9f   :  { %v1180_v13 = vpack.c.bf16 %v6990_v26, %v6997_v7  ;;  %v7033_v47 = vld [vmem:[#allocation2 + $0x110] sm:$0xff]  ;;  %v1822_v46 = vld [vmem:[#allocation3] sm:$0xff] }
  0xa0   :  { %5410 = vmatmul.mubr.msk.bf16.gmra.mrb[12].mxu1 %vm27_vm0, %v6917_v23  ;;  %v382_v1 = vpack.c.bf16 %v7033_v47, %v7031_v51  ;;  %v1838_v62 = vpack.c.bf16 %v7145_v54, %v1822_v46  ;;  %v7155_v10 = vld [vmem:[#allocation3 + $0x30] sm:$0xff]  ;;  %v7157_v12 = vld [vmem:[#allocation3 + $0x40] sm:$0xff] }
  0xa1   :  { %5415 = vmatprep.mubr.msk.bf16.mxu1 %vm27_vm0, %v375_v29  ;;  %5492 = vmatmul.mubr.msk.bf16.gmra.mrb[4].mxu0 %vm27_vm0, %v1176_v30  ;;  %v7012_v29 = vld [vmem:[#allocation2 + $0xd0] sm:$0xff]  ;;  %v7014_v30 = vld [vmem:[#allocation2 + $0xe0] sm:$0xff] }
  0xa2   :  { %5495 = vmatprep.mubr.msk.bf16.mxu0 %vm27_vm0, %v1177_v24  ;;  %v379_v24 = vpack.c.bf16 %v6995_v5, %v367_v4  ;;  %v380_v33 = vpack.c.bf16 %v7012_v29, %v7010_v27 }
  0xa8   :  { %5416 = vmatmul.mubr.msk.bf16.vlgmr.msra.gmra.mrb[0].mxu1 %vm27_vm0, %v376_v48 }
  0xa9   :  { %5419 = vmatprep.mubr.msk.bf16.mxu1 %vm27_vm0, %v377_v55  ;;  %5496 = vmatmul.mubr.msk.bf16.gmra.mrb[8].mxu0 %vm27_vm0, %v1178_v43  ;;  %v381_v43 = vpack.c.bf16 %v7016_v32, %v7014_v30 }
  0xaa   :  { %5499 = vmatprep.mubr.msk.bf16.mxu0 %vm27_vm0, %v1179_v50  ;;  %5432 = vmatpush3.bf16.msra.mxu1 %v710_v56  ;;  %v1541_v50 = vsel %vm434_vm3, %v6880_v9, 0  ;;  %v659_v9 = vld [vmem:[#allocation2 + $0x2] sm:$0xff] }
  0xab   :  { %6286 = vmatprep.subr.msk.bf16.mxu1 %vm434_vm3, %v4936_v59  ;;  %v1330_v56 = vld [vmem:[#allocation2 + $0x80] sm:$0xff]  ;;  %v675_v4 = vpack.c.bf16 %v6807_v44, %v659_v9 }
  0xac   :  { %v667_v44 = vld [vmem:[#allocation2 + $0xa2] sm:$0xff] }
  0xb0   :  { %5420 = vmatmul.mubr.msk.bf16.gmra.mrb[4].mxu1 %vm27_vm0, %v378_v14 }
  0xb1   :  { %5423 = vmatprep.mubr.msk.bf16.mxu1 %vm27_vm0, %v379_v24  ;;  %5500 = vmatmul.mubr.msk.bf16.gmra.mrb[12].mxu0 %vm27_vm0, %v1180_v13  ;;  %v1343_v13 = vpack.c.bf16 %v1331_v57, %v1330_v56  ;;  %v876_v24 = vsel %vm434_vm3, %v4936_v59, 0  ;;  %v681_v59 = vpack.c.bf16 %v6955_v45, %v6941_v34  ;;  %v7212_v57 = vld [vmem:[#allocation3 + $0x100] sm:$0xff] }
  0xb2   :  { %5505 = vmatprep.mubr.msk.bf16.mxu0 %vm27_vm0, %v376_v48  ;;  %v4981_v48 = vld [vmem:[%s8103_s2 + $0x8] sm:$0x1] }
  0xb8   :  { %5424 = vmatmul.mubr.msk.bf16.gmra.mrb[8].mxu1 %vm27_vm0, %v380_v33 }
  0xb9   :  { %5427 = vmatprep.mubr.msk.bf16.mxu1 %vm27_vm0, %v381_v43  ;;  %5506 = vmatmul.mubr.msk.bf16.vlgmr.msra.gmra.mrb[0].mxu0 %vm27_vm0, %v377_v55  ;;  %v676_v55 = vpack.c.bf16 %v6838_v60, %v6798_v37  ;;  %v1339_v37 = vld [vmem:[#allocation2 + $0x130] sm:$0xff]  ;;  %v678_v60 = vpack.c.bf16 %v6909_v20, %v6846_v0  ;;  %v1707_v0 = vsel %vm434_vm3, %v4981_v48, 0  ;;  %v841_v20 = vpack.c.bf16 %v6943_v36, %v6907_v19 }
  0xba   :  { %5522 = vmatpush3.bf16.msra.mxu0 %v1541_v50  ;;  %5509 = vmatprep.mubr.msk.bf16.mxu0 %vm27_vm0, %v378_v14  ;;  %v677_v14 = vpack.c.bf16 %v6844_v63, %v6840_v61  ;;  %v679_v61 = vpack.c.bf16 %v6896_v16, %v667_v44  ;;  %v1846_v16 = vld [vmem:[%s8105_s3] sm:$0x1]  ;;  %v844_v19 = vpack.c.bf16 %v1330_v56, %v6992_v2  ;;  %v341_v2 = vld [vmem:[%s8104_s1 + $0x78] sm:$0xff] }
  0xbb   :  { %6292 = vmatprep.subr.msk.bf16.mxu0 %vm434_vm3, %v4981_v48  ;;  %v845_v36 = vpack.c.bf16 %v7010_v27, %v6995_v5  ;;  %358 = vst.msk [vmem:[#allocation3 + $0x121] sm:$0xff] %vm27_vm0, %v341_v2  ;;  %v7179_v27 = vld [vmem:[#allocation3 + $0x70] sm:$0xff]  ;;  %v7192_v50 = vld [vmem:[#allocation3 + $0xc0] sm:$0xff] }
  0xbc   :  { %v7194_v48 = vld [vmem:[#allocation3 + $0xd0] sm:$0xff] }
  0xbd   :  { %v7202_v9 = vpack.c.bf16 %v7194_v48, %v7192_v50  ;;  %v7228_v44 = vld [vmem:[#allocation3 + $0x31] sm:$0xff] }
  0xc0   :  { %5428 = vmatmul.mubr.msk.bf16.gmra.mrb[12].mxu1 %vm27_vm0, %v382_v1 }
  0xc1   :  { %5433 = vmatprep.mubr.msk.bf16.mxu1 %vm27_vm0, %v675_v4  ;;  %5510 = vmatmul.mubr.msk.bf16.gmra.mrb[4].mxu0 %vm27_vm0, %v1343_v13  ;;  %v1987_v4 = vld [vmem:[#allocation3 + $0x1] sm:$0xff]  ;;  %v7216_v13 = vld [vmem:[#allocation3 + $0x11] sm:$0xff] }
  0xc2   :  { %5513 = vmatprep.mubr.msk.bf16.mxu0 %vm27_vm0, %v380_v33  ;;  %v1338_v33 = vld [vmem:[#allocation2 + $0x120] sm:$0xff] }
  0xc3   :  { %v1347_v63 = vpack.c.bf16 %v1339_v37, %v1338_v33  ;;  %v848_v45 = vpack.c.bf16 %v1338_v33, %v7033_v47  ;;  %v7198_v47 = vld [vmem:[#allocation3 + $0xf0] sm:$0xff]  ;;  %v7230_v33 = vld [vmem:[#allocation3 + $0x41] sm:$0xff] }
  0xc4   :  { %v7232_v37 = vld [vmem:[#allocation3 + $0x51] sm:$0xff] }
  0xc8   :  { %5434 = vmatmul.mubr.msk.bf16.vlgmr.msra.gmra.mrb[0].mxu1 %vm27_vm0, %v676_v55 }
  0xc9   :  { %5437 = vmatprep.mubr.msk.bf16.mxu1 %vm27_vm0, %v677_v14  ;;  %5514 = vmatmul.mubr.msk.bf16.gmra.mrb[8].mxu0 %vm27_vm0, %v381_v43 }
  0xca   :  { %5517 = vmatprep.mubr.msk.bf16.mxu0 %vm27_vm0, %v382_v1  ;;  %5450 = vmatpush3.bf16.msra.mxu1 %v876_v24  ;;  %v7214_v1 = vld [vmem:[#allocation3 + $0x110] sm:$0xff]  ;;  %v7226_v24 = vld [vmem:[#allocation3 + $0x21] sm:$0xff] }
  0xcb   :  { %6288 = vmatprep.subr.msk.bf16.mxu1 %vm434_vm3, %v6635_v25  ;;  %v680_v25 = vpack.c.bf16 %v6949_v41, %v6898_v17  ;;  %v682_v17 = vpack.c.bf16 %v6997_v7, %v6945_v39  ;;  %v4998_v41 = vld [vmem:[%s8105_s3 + $0x1] sm:$0x1]  ;;  %v5007_v7 = vld [vmem:[%s8105_s3 + $0x2] sm:$0x1] }
  0xcc   :  { %v2038_v5 = vsel %vm434_vm3, %v4998_v41, 0 }
  0xd0   :  { %5438 = vmatmul.mubr.msk.bf16.gmra.mrb[4].mxu1 %vm27_vm0, %v678_v60 }
  0xd1   :  { %5441 = vmatprep.mubr.msk.bf16.mxu1 %vm27_vm0, %v679_v61  ;;  %5518 = vmatmul.mubr.msk.bf16.gmra.mrb[12].mxu0 %vm27_vm0, %v1347_v63  ;;  %v7240_v61 = vpack.c.bf16 %v7232_v37, %v7230_v33  ;;  %v2204_v63 = vsel %vm434_vm3, %v5007_v7, 0 }
  0xd2   :  { %5523 = vmatprep.mubr.msk.bf16.mxu0 %vm27_vm0, %v6761_v15  ;;  %v1497_v15 = vld [vmem:[#allocation2 + $0x91] sm:$0xff] }
  0xd3   :  { %v1509_v34 = vpack.c.bf16 %v1497_v15, %v6795_v35  ;;  %v1504_v35 = vld [vmem:[#allocation2 + $0x121] sm:$0xff]  ;;  %v7254_v15 = vld [vmem:[#allocation3 + $0xb1] sm:$0xff] }
  0xd8   :  { %5442 = vmatmul.mubr.msk.bf16.gmra.mrb[8].mxu1 %vm27_vm0, %v680_v25 }
  0xd9   :  { %5445 = vmatprep.mubr.msk.bf16.mxu1 %vm27_vm0, %v681_v59  ;;  %5524 = vmatmul.mubr.msk.bf16.vlgmr.msra.gmra.mrb[0].mxu0 %vm27_vm0, %v6784_v28  ;;  %v842_v28 = vpack.c.bf16 %v6959_v49, %v6951_v42  ;;  %v1663_v42 = vld [vmem:[#allocation2 + $0x92] sm:$0xff] }
  0xda   :  { %5540 = vmatpush3.bf16.msra.mxu0 %v1707_v0  ;;  %5527 = vmatprep.mubr.msk.bf16.mxu0 %vm27_vm0, %v6801_v38  ;;  %v843_v38 = vpack.c.bf16 %v6999_v8, %v6947_v40  ;;  %v333_v40 = vld [vmem:[%s8104_s1 + $0x38] sm:$0xff]  ;;  %v1675_v49 = vpack.c.bf16 %v1663_v42, %v6911_v21  ;;  %v1014_v21 = vpack.c.bf16 %v1504_v35, %v6913_v22  ;;  %v7177_v8 = vld [vmem:[#allocation3 + $0x60] sm:$0xff] }
  0xdb   :  { %6293 = vmatprep.subr.msk.bf16.mxu0 %vm434_vm3, %v1846_v16  ;;  %350 = vst.msk [vmem:[#allocation3 + $0x81] sm:$0xff] %vm27_vm0, %v333_v40  ;;  %v7252_v0 = vld [vmem:[#allocation3 + $0x71] sm:$0xff] }
  0xdc   :  { %v7301_v42 = vld [vmem:[#allocation3 + $0x32] sm:$0xff] }
  0xe0   :  { %5446 = vmatmul.mubr.msk.bf16.gmra.mrb[12].mxu1 %vm27_vm0, %v682_v17 }
  0xe1   :  { %5451 = vmatprep.mubr.msk.bf16.mxu1 %vm27_vm0, %v841_v20  ;;  %5528 = vmatmul.mubr.msk.bf16.gmra.mrb[4].mxu0 %vm27_vm0, %v1509_v34  ;;  %v7265_v34 = vld [vmem:[#allocation3 + $0xc1] sm:$0xff] }
  0xe2   :  { %5531 = vmatprep.mubr.msk.bf16.mxu0 %vm27_vm0, %v6852_v52  ;;  %v1505_v52 = vld [vmem:[#allocation2 + $0x131] sm:$0xff] }
  0xe3   :  { %v1513_v39 = vpack.c.bf16 %v1505_v52, %v1504_v35  ;;  %v7271_v35 = vld [vmem:[#allocation3 + $0xf1] sm:$0xff] }
  0xe8   :  { %5452 = vmatmul.mubr.msk.bf16.vlgmr.msra.gmra.mrb[0].mxu1 %vm27_vm0, %v842_v28  ;;  %v7267_v28 = vld [vmem:[#allocation3 + $0xd1] sm:$0xff] }
  0xe9   :  { %5455 = vmatprep.mubr.msk.bf16.mxu1 %vm27_vm0, %v843_v38  ;;  %5532 = vmatmul.mubr.msk.bf16.gmra.mrb[8].mxu0 %vm27_vm0, %v6889_v11  ;;  %v846_v11 = vpack.c.bf16 %v7014_v30, %v7012_v29  ;;  %v1830_v29 = vld [vmem:[#allocation3 + $0xa0] sm:$0xff]  ;;  %v7181_v30 = vld [vmem:[#allocation3 + $0xb0] sm:$0xff]  ;;  %v7275_v52 = vpack.c.bf16 %v7267_v28, %v7265_v34 }
  0xea   :  { %5535 = vmatprep.mubr.msk.bf16.mxu0 %vm27_vm0, %v6917_v23  ;;  %5882 = vmatpush3.bf16.msra.mxu1 %v6657_v31  ;;  %v847_v31 = vpack.c.bf16 %v7031_v51, %v7016_v32  ;;  %v1872_v23 = vsel %vm434_vm3, %v1846_v16, 0  ;;  %v7186_v32 = vpack.c.bf16 %v7179_v27, %v7177_v8  ;;  %v1842_v43 = vpack.c.bf16 %v7181_v30, %v1830_v29  ;;  %v7196_v51 = vld [vmem:[#allocation3 + $0xe0] sm:$0xff] }
  0xeb   :  { %v7206_v56 = vpack.c.bf16 %v7198_v47, %v7196_v51  ;;  %v1995_v16 = vld [vmem:[#allocation3 + $0xa1] sm:$0xff] }
  0xec   :  { %v2007_v20 = vpack.c.bf16 %v7254_v15, %v1995_v16  ;;  %v7269_v38 = vld [vmem:[#allocation3 + $0xe1] sm:$0xff] }
  0xf0   :  { %5456 = vmatmul.mubr.msk.bf16.gmra.mrb[4].mxu1 %vm27_vm0, %v844_v19  ;;  %v7279_v19 = vpack.c.bf16 %v7271_v35, %v7269_v38 }
  0xf1   :  { %5459 = vmatprep.mubr.msk.bf16.mxu1 %vm27_vm0, %v845_v36  ;;  %5536 = vmatmul.mubr.msk.bf16.gmra.mrb[12].mxu0 %vm27_vm0, %v1513_v39  ;;  %v7285_v36 = vld [vmem:[#allocation3 + $0x101] sm:$0xff]  ;;  %v7287_v39 = vld [vmem:[#allocation3 + $0x111] sm:$0xff] }
  0xf2   :  { %5541 = vmatprep.mubr.msk.bf16.mxu0 %vm27_vm0, %v676_v55  ;;  %v7220_v55 = vpack.c.bf16 %v7214_v1, %v7212_v57 }
  0xf8   :  { %5460 = vmatmul.mubr.msk.bf16.gmra.mrb[8].mxu1 %vm27_vm0, %v846_v11  ;;  %v2153_v11 = vld [vmem:[#allocation3 + $0x2] sm:$0xff] }
  0xf9   :  { %5463 = vmatprep.mubr.msk.bf16.mxu1 %vm27_vm0, %v847_v31  ;;  %5542 = vmatmul.mubr.msk.bf16.vlgmr.msra.gmra.mrb[0].mxu0 %vm27_vm0, %v677_v14  ;;  %v2003_v14 = vpack.c.bf16 %v7216_v13, %v1987_v4  ;;  %v7289_v31 = vld [vmem:[#allocation3 + $0x12] sm:$0xff]  ;;  %v7338_v4 = vld [vmem:[#allocation3 + $0xc2] sm:$0xff] }
  0xfa   :  { %5558 = vmatpush3.bf16.msra.mxu0 %v1872_v23  ;;  %5545 = vmatprep.mubr.msk.bf16.mxu0 %vm27_vm0, %v678_v60  ;;  %v7236_v60 = vpack.c.bf16 %v7228_v44, %v7226_v24  ;;  %v7293_v23 = vpack.c.bf16 %v7287_v39, %v7285_v36  ;;  %v2169_v40 = vpack.c.bf16 %v7289_v31, %v2153_v11  ;;  %v7358_v11 = vld [vmem:[#allocation3 + $0x102] sm:$0xff] }
  0xfb   :  { %6294 = vmatprep.subr.msk.bf16.mxu0 %vm434_vm3, %v4998_v41  ;;  %v7299_v41 = vld [vmem:[#allocation3 + $0x22] sm:$0xff] }
  0xfc   :  { %v7309_v2 = vpack.c.bf16 %v7301_v42, %v7299_v41 }
 0x100   :  { %5464 = vmatmul.mubr.msk.bf16.gmra.mrb[12].mxu1 %vm27_vm0, %v848_v45  ;;  %v7303_v45 = vld [vmem:[#allocation3 + $0x42] sm:$0xff] }
 0x101   :  { %5477 = vmatprep.mubr.msk.bf16.mxu1 %vm27_vm0, %v1011_v58  ;;  %5546 = vmatmul.mubr.msk.bf16.gmra.mrb[4].mxu0 %vm27_vm0, %v1675_v49  ;;  %v1671_v58 = vld [vmem:[#allocation2 + $0x132] sm:$0xff] }
 0x102   :  { %5549 = vmatprep.mubr.msk.bf16.mxu0 %vm27_vm0, %v680_v25  ;;  %v1679_v53 = vpack.c.bf16 %v1671_v58, %v6990_v26  ;;  %v5016_v25 = vld [vmem:[%s8105_s3 + $0x3] sm:$0x1]  ;;  %v7305_v49 = vld [vmem:[#allocation3 + $0x52] sm:$0xff] }
 0x103   :  { %v7313_v46 = vpack.c.bf16 %v7305_v49, %v7303_v45  ;;  %v2370_v58 = vsel %vm434_vm3, %v5016_v25, 0 }
 0x108   :  { %5478 = vmatmul.mubr.msk.bf16.vlgmr.msra.gmra.mrb[8].mxu1 %vm27_vm0, %v1012_v6  ;;  %v7153_v6 = vld [vmem:[#allocation3 + $0x20] sm:$0xff] }
 0x109   :  { %5481 = vmatprep.mubr.msk.bf16.mxu1 %vm27_vm0, %v1013_v18  ;;  %5550 = vmatmul.mubr.msk.bf16.gmra.mrb[8].mxu0 %vm27_vm0, %v681_v59  ;;  %v7159_v18 = vld [vmem:[#allocation3 + $0x50] sm:$0xff]  ;;  %v7163_v22 = vpack.c.bf16 %v7155_v10, %v7153_v6  ;;  %v7250_v59 = vld [vmem:[#allocation3 + $0x61] sm:$0xff] }
 0x10a   :  { %5553 = vmatprep.mubr.msk.bf16.mxu0 %vm27_vm0, %v682_v17  ;;  %v7167_v26 = vpack.c.bf16 %v7159_v18, %v7157_v12  ;;  %v7259_v17 = vpack.c.bf16 %v7252_v0, %v7250_v59  ;;  %v2337_v3 = vpack.c.bf16 %v7177_v8, %v7159_v18  ;;  %v7396_v18 = vld [vmem:[#allocation3 + $0x120] sm:$0xff] }
 0x10b   :  { %v2342_v8 = vpack.c.bf16 %v7396_v18, %v7214_v1  ;;  %v2505_v1 = vpack.c.bf16 %v7265_v34, %v7254_v15 }
 0x110   :  { %5482 = vmatmul.mubr.msk.bf16.gmra.mrb[12].mxu1 %vm27_vm0, %v1014_v21  ;;  %v5025_v21 = vld [vmem:[%s8105_s3 + $0x4] sm:$0x1] }
 0x111   :  { %5554 = vmatmul.mubr.msk.bf16.gmra.mrb[12].mxu0 %vm27_vm0, %v1679_v53  ;;  %v7325_v53 = vld [vmem:[#allocation3 + $0x72] sm:$0xff] }
 0x112   :  { %5559 = vmatprep.mubr.msk.bf16.mxu0 %vm27_vm0, %v1838_v62  ;;  %v7323_v62 = vld [vmem:[#allocation3 + $0x62] sm:$0xff] }
 0x113   :  { %v7332_v29 = vpack.c.bf16 %v7325_v53, %v7323_v62  ;;  %v2669_v15 = vpack.c.bf16 %v7323_v62, %v7305_v49 }
 0x119   :  { %5560 = vmatmul.mubr.msk.bf16.vlgmr.msra.gmra.mrb[0].mxu0 %vm27_vm0, %v7163_v22 }
 0x11a   :  { %5576 = vmatpush3.bf16.msra.mxu0 %v2038_v5  ;;  %5563 = vmatprep.mubr.msk.bf16.mxu0 %vm27_vm0, %v7167_v26  ;;  %v2161_v5 = vld [vmem:[#allocation3 + $0xa2] sm:$0xff] }
 0x11b   :  { %6295 = vmatprep.subr.msk.bf16.mxu0 %vm434_vm3, %v5007_v7  ;;  %v7327_v7 = vld [vmem:[#allocation3 + $0xb2] sm:$0xff] }
 0x121   :  { %5564 = vmatmul.mubr.msk.bf16.gmra.mrb[4].mxu0 %vm27_vm0, %v7186_v32 }
 0x122   :  { %5567 = vmatprep.mubr.msk.bf16.mxu0 %vm27_vm0, %v1842_v43  ;;  %v2173_v43 = vpack.c.bf16 %v7327_v7, %v2161_v5  ;;  %v2335_v5 = vpack.c.bf16 %v7153_v6, %v7145_v54  ;;  %v7381_v54 = vld [vmem:[#allocation3 + $0x80] sm:$0xff] }
 0x123   :  { %v2338_v6 = vpack.c.bf16 %v7381_v54, %v7179_v27  ;;  %v2501_v27 = vpack.c.bf16 %v7226_v24, %v7216_v13  ;;  %v2506_v13 = vpack.c.bf16 %v7269_v38, %v7267_v28  ;;  %v2507_v24 = vpack.c.bf16 %v7285_v36, %v7271_v35  ;;  %v5052_v28 = vld [vmem:[%s8105_s3 + $0x7] sm:$0x1] }
 0x124   :  { %v7455_v38 = vld [vmem:[#allocation3 + $0x82] sm:$0xff] }
 0x129   :  { %5568 = vmatmul.mubr.msk.bf16.gmra.mrb[8].mxu0 %vm27_vm0, %v7202_v9 }
 0x12a   :  { %5571 = vmatprep.mubr.msk.bf16.mxu0 %vm27_vm0, %v7206_v56 }
 0x131   :  { %5572 = vmatmul.mubr.msk.bf16.gmra.mrb[12].mxu0 %vm27_vm0, %v7220_v55 }
 0x132   :  { %5577 = vmatprep.mubr.msk.bf16.mxu0 %vm27_vm0, %v2003_v14  ;;  %v7340_v14 = vld [vmem:[#allocation3 + $0xd2] sm:$0xff] }
 0x133   :  { %v7348_v16 = vpack.c.bf16 %v7340_v14, %v7338_v4 }
 0x135   :  { %8117 = vst [vmem:[#allocation5_spill] sm:$0xff] %v7348_v16 }
 0x139   :  { %5578 = vmatmul.mubr.msk.bf16.vlgmr.msra.gmra.mrb[0].mxu0 %vm27_vm0, %v7236_v60 }
 0x13a   :  { %5594 = vmatpush3.bf16.msra.mxu0 %v2204_v63  ;;  %5581 = vmatprep.mubr.msk.bf16.mxu0 %vm27_vm0, %v7240_v61  ;;  %v7342_v63 = vld [vmem:[#allocation3 + $0xe2] sm:$0xff] }
 0x13b   :  { %6296 = vmatprep.subr.msk.bf16.mxu0 %vm434_vm3, %v5016_v25  ;;  %v7344_v25 = vld [vmem:[#allocation3 + $0xf2] sm:$0xff]  ;;  %v2672_v62 = vpack.c.bf16 %v7342_v63, %v7340_v14  ;;  %v5061_v14 = vld [vmem:[%s8105_s3 + $0x8] sm:$0x1] }
 0x141   :  { %5582 = vmatmul.mubr.msk.bf16.gmra.mrb[4].mxu0 %vm27_vm0, %v7259_v17 }
 0x142   :  { %5585 = vmatprep.mubr.msk.bf16.mxu0 %vm27_vm0, %v2007_v20  ;;  %v7352_v20 = vpack.c.bf16 %v7344_v25, %v7342_v63  ;;  %v2825_v63 = vld [vmem:[#allocation3 + $0x90] sm:$0xff] }
 0x144   :  { %8118 = vst [vmem:[#allocation6_spill] sm:$0xff] %v7352_v20 }
 0x149   :  { %5586 = vmatmul.mubr.msk.bf16.gmra.mrb[8].mxu0 %vm27_vm0, %v7275_v52 }
 0x14a   :  { %5589 = vmatprep.mubr.msk.bf16.mxu0 %vm27_vm0, %v7279_v19 }
 0x151   :  { %5590 = vmatmul.mubr.msk.bf16.gmra.mrb[12].mxu0 %vm27_vm0, %v7293_v23 }
 0x152   :  { %5595 = vmatprep.mubr.msk.bf16.mxu0 %vm27_vm0, %v2169_v40  ;;  %v7360_v40 = vld [vmem:[#allocation3 + $0x112] sm:$0xff] }
 0x159   :  { %5596 = vmatmul.mubr.msk.bf16.vlgmr.msra.gmra.mrb[0].mxu0 %vm27_vm0, %v7309_v2 }
 0x15a   :  { %5612 = vmatpush3.bf16.msra.mxu0 %v2370_v58  ;;  %5599 = vmatprep.mubr.msk.bf16.mxu0 %vm27_vm0, %v7313_v46  ;;  %v7364_v58 = vpack.c.bf16 %v7360_v40, %v7358_v11 }
 0x15b   :  { %6297 = vmatprep.subr.msk.bf16.mxu0 %vm434_vm3, %v5025_v21 }
 0x161   :  { %5600 = vmatmul.mubr.msk.bf16.gmra.mrb[4].mxu0 %vm27_vm0, %v7332_v29 }
 0x162   :  { %5603 = vmatprep.mubr.msk.bf16.mxu0 %vm27_vm0, %v2173_v43  ;;  %v2336_v43 = vpack.c.bf16 %v7157_v12, %v7155_v10  ;;  %v2339_v10 = vpack.c.bf16 %v7192_v50, %v7181_v30  ;;  %v2340_v12 = vpack.c.bf16 %v7196_v51, %v7194_v48  ;;  %v2502_v30 = vpack.c.bf16 %v7230_v33, %v7228_v44  ;;  %v5043_v51 = vld [vmem:[%s8105_s3 + $0x6] sm:$0x1] }
 0x163   :  { %v2503_v50 = vpack.c.bf16 %v7250_v59, %v7232_v37  ;;  %v7429_v44 = vld [vmem:[#allocation3 + $0x121] sm:$0xff]  ;;  %v2667_v37 = vpack.c.bf16 %v7299_v41, %v7289_v31  ;;  %v8119_v59 = vmov 0.0   ;;  %v2869_v34 = vsel %vm434_vm3, %v5043_v51, 0 }
 0x164   :  { %v2508_v33 = vpack.c.bf16 %v7429_v44, %v7287_v39  ;;  %129 = vst.msk [vmem:[#allocation4] sm:$0xff] %vm128_vm4, %v8119_v59  ;;  %132 = vst.msk [vmem:[#allocation4 + $0xa0] sm:$0xff] %vm128_vm4, %v8119_v59  ;;  %v2670_v31 = vpack.c.bf16 %v7455_v38, %v7325_v53  ;;  %v2673_v53 = vpack.c.bf16 %v7358_v11, %v7344_v25 }
 0x165   :  { %135 = vst.msk [vmem:[#allocation4 + $0x90] sm:$0xff] %vm128_vm4, %v8119_v59  ;;  %137 = vst.msk [vmem:[#allocation4 + $0x130] sm:$0xff] %vm128_vm4, %v8119_v59 }
 0x166   :  { %131 = vst.msk [vmem:[#allocation4 + $0x8] sm:$0x3] %vm130_vm5, %v8119_v59  ;;  %133 = vst.msk [vmem:[#allocation4 + $0xa8] sm:$0x3] %vm130_vm5, %v8119_v59 }
 0x167   :  { %136 = vst.msk [vmem:[#allocation4 + $0x98] sm:$0x3] %vm130_vm5, %v8119_v59  ;;  %138 = vst.msk [vmem:[#allocation4 + $0x138] sm:$0x3] %vm130_vm5, %v8119_v59 }
 0x168   :  { %140 = vst.msk [vmem:[#allocation4] sm:$0x1] %vm139_vm6, %v8119_v59  ;;  %141 = vst.msk [vmem:[#allocation4 + $0x10] sm:$0x1] %vm139_vm6, %v8119_v59 }
 0x169   :  { %5604 = vmatmul.mubr.msk.bf16.gmra.mrb[8].mxu0 %vm27_vm0, %v7348_v16  ;;  %v5034_v16 = vld [vmem:[%s8105_s3 + $0x5] sm:$0x1]  ;;  %142 = vst.msk [vmem:[#allocation4 + $0x20] sm:$0x1] %vm139_vm6, %v8119_v59  ;;  %143 = vst.msk [vmem:[#allocation4 + $0x30] sm:$0x1] %vm139_vm6, %v8119_v59 }
 0x16a   :  { %5607 = vmatprep.mubr.msk.bf16.mxu0 %vm27_vm0, %v7352_v20  ;;  %v2536_v20 = vsel %vm434_vm3, %v5025_v21, 0  ;;  %v2702_v48 = vsel %vm434_vm3, %v5034_v16, 0  ;;  %144 = vst.msk [vmem:[#allocation4 + $0x40] sm:$0x1] %vm139_vm6, %v8119_v59  ;;  %145 = vst.msk [vmem:[#allocation4 + $0x50] sm:$0x1] %vm139_vm6, %v8119_v59 }
 0x16b   :  { %146 = vst.msk [vmem:[#allocation4 + $0x60] sm:$0x1] %vm139_vm6, %v8119_v59  ;;  %147 = vst.msk [vmem:[#allocation4 + $0x70] sm:$0x1] %vm139_vm6, %v8119_v59 }
 0x16c   :  { %148 = vst.msk [vmem:[#allocation4 + $0x80] sm:$0x1] %vm139_vm6, %v8119_v59  ;;  %149 = vst.msk [vmem:[#allocation4 + $0x90] sm:$0x1] %vm139_vm6, %v8119_v59 }
 0x16d   :  { %150 = vst.msk [vmem:[#allocation4 + $0xa0] sm:$0x1] %vm139_vm6, %v8119_v59  ;;  %151 = vst.msk [vmem:[#allocation4 + $0xb0] sm:$0x1] %vm139_vm6, %v8119_v59 }
 0x16e   :  { %152 = vst.msk [vmem:[#allocation4 + $0xc0] sm:$0x1] %vm139_vm6, %v8119_v59  ;;  %153 = vst.msk [vmem:[#allocation4 + $0xd0] sm:$0x1] %vm139_vm6, %v8119_v59 }
 0x16f   :  { %154 = vst.msk [vmem:[#allocation4 + $0xe0] sm:$0x1] %vm139_vm6, %v8119_v59  ;;  %155 = vst.msk [vmem:[#allocation4 + $0xf0] sm:$0x1] %vm139_vm6, %v8119_v59 }
 0x170   :  { %156 = vst.msk [vmem:[#allocation4 + $0x100] sm:$0x1] %vm139_vm6, %v8119_v59  ;;  %157 = vst.msk [vmem:[#allocation4 + $0x110] sm:$0x1] %vm139_vm6, %v8119_v59 }
 0x171   :  { %5608 = vmatmul.mubr.msk.bf16.gmra.mrb[12].mxu0 %vm27_vm0, %v7364_v58  ;;  %158 = vst.msk [vmem:[#allocation4 + $0x120] sm:$0x1] %vm139_vm6, %v8119_v59  ;;  %159 = vst.msk [vmem:[#allocation4 + $0x130] sm:$0x1] %vm139_vm6, %v8119_v59 }
 0x172   :  { %5613 = vmatprep.mubr.msk.bf16.mxu0 %vm27_vm0, %v2335_v5  ;;  %161 = vst.msk [vmem:[#allocation4 + $0x19] sm:$0x1] %vm139_vm6, %v8119_v59  ;;  %162 = vst.msk [vmem:[#allocation4 + $0x29] sm:$0x1] %vm139_vm6, %v8119_v59 }
 0x173   :  { %163 = vst.msk [vmem:[#allocation4 + $0x39] sm:$0x1] %vm139_vm6, %v8119_v59  ;;  %164 = vst.msk [vmem:[#allocation4 + $0x49] sm:$0x1] %vm139_vm6, %v8119_v59 }
 0x174   :  { %165 = vst.msk [vmem:[#allocation4 + $0x59] sm:$0x1] %vm139_vm6, %v8119_v59  ;;  %166 = vst.msk [vmem:[#allocation4 + $0x69] sm:$0x1] %vm139_vm6, %v8119_v59 }
 0x175   :  { %167 = vst.msk [vmem:[#allocation4 + $0x79] sm:$0x1] %vm139_vm6, %v8119_v59  ;;  %168 = vst.msk [vmem:[#allocation4 + $0x89] sm:$0x1] %vm139_vm6, %v8119_v59 }
 0x176   :  { %171 = vst.msk [vmem:[#allocation4 + $0xb9] sm:$0x1] %vm139_vm6, %v8119_v59  ;;  %172 = vst.msk [vmem:[#allocation4 + $0xc9] sm:$0x1] %vm139_vm6, %v8119_v59 }
 0x177   :  { %173 = vst.msk [vmem:[#allocation4 + $0xd9] sm:$0x1] %vm139_vm6, %v8119_v59  ;;  %174 = vst.msk [vmem:[#allocation4 + $0xe9] sm:$0x1] %vm139_vm6, %v8119_v59 }
 0x178   :  { %175 = vst.msk [vmem:[#allocation4 + $0xf9] sm:$0x1] %vm139_vm6, %v8119_v59  ;;  %176 = vst.msk [vmem:[#allocation4 + $0x109] sm:$0x1] %vm139_vm6, %v8119_v59 }
 0x179   :  { %5614 = vmatmul.mubr.msk.bf16.vlgmr.msra.gmra.mrb[0].mxu0 %vm27_vm0, %v2336_v43  ;;  %177 = vst.msk [vmem:[#allocation4 + $0x119] sm:$0x1] %vm139_vm6, %v8119_v59  ;;  %178 = vst.msk [vmem:[#allocation4 + $0x129] sm:$0x1] %vm139_vm6, %v8119_v59 }
 0x17a   :  { %5630 = vmatpush3.bf16.msra.mxu0 %v2536_v20  ;;  %5617 = vmatprep.mubr.msk.bf16.mxu0 %vm27_vm0, %v2337_v3  ;;  %v2341_v3 = vpack.c.bf16 %v7212_v57, %v7198_v47  ;;  %v7414_v47 = vld [vmem:[#allocation3 + $0x81] sm:$0xff]  ;;  %v3035_v20 = vsel %vm434_vm3, %v5052_v28, 0  ;;  %160 = vst.msk [vmem:[#allocation4 + $0x9] sm:$0x1] %vm139_vm6, %v8119_v59  ;;  %169 = vst.msk [vmem:[#allocation4 + $0x99] sm:$0x1] %vm139_vm6, %v8119_v59 }
 0x17b   :  { %6298 = vmatprep.subr.msk.bf16.mxu0 %vm434_vm3, %v5034_v16  ;;  %v2504_v57 = vpack.c.bf16 %v7414_v47, %v7252_v0  ;;  %v2668_v0 = vpack.c.bf16 %v7303_v45, %v7301_v42  ;;  %v2671_v42 = vpack.c.bf16 %v7338_v4, %v7327_v7  ;;  %v2666_v7 = vld [vmem:[#allocation3 + $0x122] sm:$0xff]  ;;  %170 = vst.msk [vmem:[#allocation4 + $0xa9] sm:$0x1] %vm139_vm6, %v8119_v59  ;;  %179 = vst.msk [vmem:[#allocation4 + $0x139] sm:$0x1] %vm139_vm6, %v8119_v59 }
 0x17c   :  { %v2674_v4 = vpack.c.bf16 %v2666_v7, %v7360_v40  ;;  %v2837_v40 = vpack.c.bf16 %v2825_v63, %v7381_v54  ;;  %v2833_v54 = vld [vmem:[#allocation3 + $0x130] sm:$0xff] }
 0x181   :  { %5618 = vmatmul.mubr.msk.bf16.gmra.mrb[4].mxu0 %vm27_vm0, %v2338_v6 }
 0x182   :  { %5621 = vmatprep.mubr.msk.bf16.mxu0 %vm27_vm0, %v2339_v10  ;;  %v2841_v10 = vpack.c.bf16 %v2833_v54, %v7396_v18  ;;  %v7653_v18 = vld [vmem:[%s8107_s4] ss:$0 sm:$0xff] }
 0x189   :  { %5622 = vmatmul.mubr.msk.bf16.gmra.mrb[8].mxu0 %vm27_vm0, %v2340_v12 }
 0x18a   :  { %5625 = vmatprep.mubr.msk.bf16.mxu0 %vm27_vm0, %v2341_v3 }
 0x191   :  { %5626 = vmatmul.mubr.msk.bf16.gmra.mrb[12].mxu0 %vm27_vm0, %v2342_v8 }
 0x192   :  { %5631 = vmatprep.mubr.msk.bf16.mxu0 %vm27_vm0, %v2501_v27 }
 0x199   :  { %5632 = vmatmul.mubr.msk.bf16.vlgmr.msra.gmra.mrb[0].mxu0 %vm27_vm0, %v2502_v30 }
 0x19a   :  { %5648 = vmatpush3.bf16.msra.mxu0 %v2702_v48  ;;  %5635 = vmatprep.mubr.msk.bf16.mxu0 %vm27_vm0, %v2503_v50 }
 0x19b   :  { %6299 = vmatprep.subr.msk.bf16.mxu0 %vm434_vm3, %v5043_v51 }
 0x1a1   :  { %5636 = vmatmul.mubr.msk.bf16.gmra.mrb[4].mxu0 %vm27_vm0, %v2504_v57 }
 0x1a2   :  { %5639 = vmatprep.mubr.msk.bf16.mxu0 %vm27_vm0, %v2505_v1 }
 0x1a9   :  { %5640 = vmatmul.mubr.msk.bf16.gmra.mrb[8].mxu0 %vm27_vm0, %v2506_v13 }
 0x1aa   :  { %5643 = vmatprep.mubr.msk.bf16.mxu0 %vm27_vm0, %v2507_v24 }
 0x1b1   :  { %5644 = vmatmul.mubr.msk.bf16.gmra.mrb[12].mxu0 %vm27_vm0, %v2508_v33 }
 0x1b2   :  { %5649 = vmatprep.mubr.msk.bf16.mxu0 %vm27_vm0, %v2667_v37 }
 0x1b9   :  { %5650 = vmatmul.mubr.msk.bf16.vlgmr.msra.gmra.mrb[0].mxu0 %vm27_vm0, %v2668_v0 }
 0x1ba   :  { %5666 = vmatpush3.bf16.msra.mxu0 %v2869_v34  ;;  %5653 = vmatprep.mubr.msk.bf16.mxu0 %vm27_vm0, %v2669_v15 }
 0x1bb   :  { %v7457_v35 = vpop.f32.mrb[0].mxu1  ;;  %6300 = vmatprep.subr.msk.bf16.mxu0 %vm434_vm3, %v5052_v28 }
 0x1bc   :  { %v7460_v36 = vpop.f32.mrb[1].mxu1 }
 0x1bd   :  { %v7462_v39 = vpop.f32.mrb[2].mxu1 }
 0x1be   :  { %v7466_v41 = vpop.f32.mrb[3].mxu1 }
 0x1c1   :  { %5654 = vmatmul.mubr.msk.bf16.gmra.mrb[4].mxu0 %vm27_vm0, %v2670_v31 }
 0x1c2   :  { %5657 = vmatprep.mubr.msk.bf16.mxu0 %vm27_vm0, %v2671_v42 }
 0x1c3   :  { %v7472_v45 = vpop.f32.mrb[4].mxu1 }
 0x1c4   :  { %v7474_v49 = vpop.f32.mrb[5].mxu1 }
 0x1c5   :  { %v7476_v21 = vpop.f32.mrb[6].mxu1 }
 0x1c6   :  { %v7480_v16 = vpop.f32.mrb[7].mxu1 }
 0x1c9   :  { %5658 = vmatmul.mubr.msk.bf16.gmra.mrb[8].mxu0 %vm27_vm0, %v2672_v62 }
 0x1ca   :  { %5661 = vmatprep.mubr.msk.bf16.mxu0 %vm27_vm0, %v2673_v53  ;;  %v3397_v53 = vld [vmem:[#allocation4 + $0x1] sm:$0xff] }
 0x1d1   :  { %5662 = vmatmul.mubr.msk.bf16.gmra.mrb[12].mxu0 %vm27_vm0, %v2674_v4 }
 0x1d2   :  { %5667 = vmatprep.mubr.msk.bf16.mxu0 %vm27_vm0, %v7163_v22 }
 0x1d9   :  { %5668 = vmatmul.mubr.msk.bf16.vlgmr.msra.gmra.mrb[0].mxu0 %vm27_vm0, %v7167_v26 }
 0x1da   :  { %5684 = vmatpush3.bf16.msra.mxu0 %v3035_v20  ;;  %5671 = vmatprep.mubr.msk.bf16.mxu0 %vm27_vm0, %v7186_v32 }
 0x1db   :  { %v7498_v25 = vpop.f32.mrb[8].mxu1  ;;  %6301 = vmatprep.subr.msk.bf16.mxu0 %vm434_vm3, %v5061_v14 }
 0x1dc   :  { %v7501_v11 = vpop.f32.mrb[9].mxu1 }
 0x1dd   :  { %v7503_v22 = vpop.f32.mrb[10].mxu1 }
 0x1de   :  { %v7506_v5 = vpop.f32.mrb[11].mxu1 }
 0x1e1   :  { %5672 = vmatmul.mubr.msk.bf16.gmra.mrb[4].mxu0 %vm27_vm0, %v2837_v40 }
 0x1e2   :  { %5675 = vmatprep.mubr.msk.bf16.mxu0 %vm27_vm0, %v7202_v9  ;;  %v3201_v9 = vsel %vm434_vm3, %v5061_v14, 0 }
 0x1e3   :  { %v7511_v26 = vpop.f32.mrb[12].mxu1 }
 0x1e4   :  { %v7513_v32 = vpop.f32.mrb[13].mxu1 }
 0x1e5   :  { %v7515_v43 = vpop.f32.mrb[14].mxu1 }
 0x1e6   :  { %v7517_v6 = vpop.f32.mrb[15].mxu1 }
 0x1e9   :  { %5676 = vmatmul.mubr.msk.bf16.gmra.mrb[8].mxu0 %vm27_vm0, %v7206_v56  ;;  %v2991_v56 = vld [vmem:[#allocation3 + $0x91] sm:$0xff] }
 0x1ea   :  { %5679 = vmatprep.mubr.msk.bf16.mxu0 %vm27_vm0, %v7220_v55  ;;  %v3003_v55 = vpack.c.bf16 %v2991_v56, %v7414_v47 }
 0x1f1   :  { %5680 = vmatmul.mubr.msk.bf16.gmra.mrb[12].mxu0 %vm27_vm0, %v2841_v10 }
 0x1f2   :  { %5685 = vmatprep.mubr.msk.bf16.mxu0 %vm27_vm0, %v7236_v60  ;;  %v2999_v60 = vld [vmem:[#allocation3 + $0x131] sm:$0xff] }
 0x1f9   :  { %5686 = vmatmul.mubr.msk.bf16.vlgmr.msra.gmra.mrb[0].mxu0 %vm27_vm0, %v7240_v61  ;;  %v3007_v61 = vpack.c.bf16 %v2999_v60, %v7429_v44 }
 0x1fa   :  { %5702 = vmatpush3.bf16.msra.mxu0 %v3201_v9  ;;  %5689 = vmatprep.mubr.msk.bf16.mxu0 %vm27_vm0, %v7259_v17  ;;  %v3157_v17 = vld [vmem:[#allocation3 + $0x92] sm:$0xff] }
 0x201   :  { %5690 = vmatmul.mubr.msk.bf16.gmra.mrb[4].mxu0 %vm27_vm0, %v3003_v55 }
 0x202   :  { %5693 = vmatprep.mubr.msk.bf16.mxu0 %vm27_vm0, %v7275_v52  ;;  %v3169_v52 = vpack.c.bf16 %v3157_v17, %v7455_v38 }
 0x209   :  { %5694 = vmatmul.mubr.msk.bf16.gmra.mrb[8].mxu0 %vm27_vm0, %v7279_v19  ;;  %v8120_v19 = vld [vmem:[#allocation5_spill] sm:$0xff] }
 0x20a   :  { %5697 = vmatprep.mubr.msk.bf16.mxu0 %vm27_vm0, %v7293_v23  ;;  %v8121_v23 = vld [vmem:[#allocation6_spill] sm:$0xff] }
 0x211   :  { %5698 = vmatmul.mubr.msk.bf16.gmra.mrb[12].mxu0 %vm27_vm0, %v3007_v61 }
 0x212   :  { %5703 = vmatprep.mubr.msk.bf16.mxu0 %vm27_vm0, %v7309_v2  ;;  %v3165_v2 = vld [vmem:[#allocation3 + $0x132] sm:$0xff] }
 0x213   :  { %v3173_v12 = vpack.c.bf16 %v3165_v2, %v2666_v7 }
 0x219   :  { %5704 = vmatmul.mubr.msk.bf16.vlgmr.msra.gmra.mrb[0].mxu0 %vm27_vm0, %v7313_v46  ;;  %v5071_v46 = vld [vmem:[%s8106_s5 + $0x4] sm:$0xf] }
 0x21a   :  { %5707 = vmatprep.mubr.msk.bf16.mxu0 %vm27_vm0, %v7332_v29  ;;  %6302 = vmatprep.subr.msk.bf16.mxu1 %vm3447_vm7, %v5071_v46  ;;  %v3449_v29 = vsel %vm3447_vm7, %v5071_v46, 0  ;;  %v7711_v46 = vld [vmem:[%s8106_s5 + $0x8] sm:$0xf] }
 0x21b   :  { %5720 = vmatpush3.bf16.msra.mxu1 %v3449_v29 }
 0x221   :  { %5708 = vmatmul.mubr.msk.bf16.gmra.mrb[4].mxu0 %vm27_vm0, %v3169_v52 }
 0x222   :  { %5711 = vmatprep.mubr.msk.bf16.mxu0 %vm27_vm0, %v8120_v19 }
 0x229   :  { %5712 = vmatmul.mubr.msk.bf16.gmra.mrb[8].mxu0 %vm27_vm0, %v8121_v23 }
 0x22a   :  { %5715 = vmatprep.mubr.msk.bf16.mxu0 %vm27_vm0, %v7364_v58  ;;  %v3396_v58 = vld [vmem:[%s8106_s5] sm:$0xf] }
 0x22b   :  { %6303 = vmatprep.subr.msk.bf16.mxu1 %vm3447_vm7, %v3396_v58  ;;  %v3573_v19 = vsel %vm3447_vm7, %v3396_v58, 0 }
 0x231   :  { %5716 = vmatmul.mubr.msk.bf16.gmra.mrb[12].mxu0 %vm27_vm0, %v3173_v12 }
 0x2ec   :  { %v5705_v3 = vpop.f32.mrb[0].mxu0 }
 0x2ed   :  { %v5883_v8 = vadd.f32 %v5705_v3, %v7457_v35  ;;  %v3237_v27 = vpop.f32.mrb[1].mxu0 }
 0x2ee   :  { %v5884_v30 = vadd.f32 %v3237_v27, %v7460_v36  ;;  %v5706_v50 = vpop.f32.mrb[2].mxu0 }
 0x2ef   :  { %v3325_v48 = vadd.f32 %v5883_v8, %v7653_v18  ;;  %v5885_v51 = vadd.f32 %v5706_v50, %v7462_v39  ;;  %v3240_v47 = vpop.f32.mrb[3].mxu0 }
 0x2f0   :  { %v3323_v57 = vadd.f32 %v5884_v30, %v7653_v18  ;;  %v5886_v1 = vadd.f32 %v3240_v47, %v7466_v41 }
 0x2f1   :  { %v3341_v13 = vmax.f32 %v3325_v48, 0.0  ;;  %v3326_v24 = vadd.f32 %v5885_v51, %v7653_v18 }
 0x2f2   :  { %v3339_v44 = vmax.f32 %v3323_v57, 0.0  ;;  %v3324_v33 = vadd.f32 %v5886_v1, %v7653_v18 }
 0x2f3   :  { %3358 = vst.msk [vmem:[#allocation4 + $0x31] sm:$0xff] %vm128_vm4, %v3341_v13  ;;  %v3342_v37 = vmax.f32 %v3326_v24, 0.0 }
 0x2f4   :  { %3356 = vst.msk [vmem:[#allocation4 + $0x11] sm:$0xff] %vm128_vm4, %v3339_v44  ;;  %v3340_v59 = vmax.f32 %v3324_v33, 0.0  ;;  %v5709_v0 = vpop.f32.mrb[4].mxu0 }
 0x2f5   :  { %3359 = vst.msk [vmem:[#allocation4 + $0x41] sm:$0xff] %vm128_vm4, %v3342_v37  ;;  %v5887_v15 = vadd.f32 %v5709_v0, %v7472_v45  ;;  %v3253_v34 = vpop.f32.mrb[5].mxu0 }
 0x2f6   :  { %3357 = vst.msk [vmem:[#allocation4 + $0x21] sm:$0xff] %vm128_vm4, %v3340_v59  ;;  %v5888_v28 = vadd.f32 %v3253_v34, %v7474_v49  ;;  %v5710_v38 = vpop.f32.mrb[6].mxu0 }
 0x2f7   :  { %v3329_v35 = vadd.f32 %v5887_v15, %v7653_v18  ;;  %v5889_v36 = vadd.f32 %v5710_v38, %v7476_v21  ;;  %v3256_v39 = vpop.f32.mrb[7].mxu0 }
 0x2f8   :  { %v3327_v31 = vadd.f32 %v5888_v28, %v7653_v18  ;;  %v5890_v41 = vadd.f32 %v3256_v39, %v7480_v16 }
 0x2f9   :  { %v3345_v42 = vmax.f32 %v3329_v35, 0.0  ;;  %v3330_v62 = vadd.f32 %v5889_v36, %v7653_v18 }
 0x2fa   :  { %v3343_v45 = vmax.f32 %v3327_v31, 0.0  ;;  %v3328_v7 = vadd.f32 %v5890_v41, %v7653_v18  ;;  %v7678_v20 = vld [vmem:[#allocation4 + $0x31] sm:$0xff] }
 0x2fb   :  { %3362 = vst.msk [vmem:[#allocation4 + $0x71] sm:$0xff] %vm128_vm4, %v3345_v42  ;;  %v3346_v49 = vmax.f32 %v3330_v62, 0.0  ;;  %v7676_v4 = vld [vmem:[#allocation4 + $0x11] sm:$0xff] }
 0x2fc   :  { %3360 = vst.msk [vmem:[#allocation4 + $0x51] sm:$0xff] %vm128_vm4, %v3343_v45  ;;  %v3344_v21 = vmax.f32 %v3328_v7, 0.0  ;;  %v5713_v14 = vpop.f32.mrb[8].mxu0  ;;  %v3413_v16 = vpack.c.bf16 %v7676_v4, %v3397_v53  ;;  %v7682_v63 = vld [vmem:[#allocation4 + $0x41] sm:$0xff]  ;;  %v7684_v40 = vld [vmem:[#allocation4 + $0x32] sm:$0xff] }
 0x2fd   :  { %v7686_v54 = vld [vmem:[#allocation4 + $0x42] sm:$0xff]  ;;  %3363 = vst.msk [vmem:[#allocation4 + $0x81] sm:$0xff] %vm128_vm4, %v3346_v49  ;;  %v5891_v10 = vadd.f32 %v5713_v14, %v7498_v25  ;;  %v3269_v9 = vpop.f32.mrb[9].mxu0 }
 0x2fe   :  { %v7690_v56 = vld [vmem:[#allocation4 + $0x21] sm:$0xff]  ;;  %3361 = vst.msk [vmem:[#allocation4 + $0x61] sm:$0xff] %vm128_vm4, %v3344_v21  ;;  %v5892_v17 = vadd.f32 %v3269_v9, %v7501_v11  ;;  %v5714_v52 = vpop.f32.mrb[10].mxu0  ;;  %5721 = vmatprep.mubr.msk.bf16.mxu1 %vm128_vm4, %v3413_v16  ;;  %v7713_v11 = vld [vmem:[#allocation4 + $0x12] sm:$0xff] }
 0x2ff   :  { %v7692_v55 = vld [vmem:[#allocation4 + $0x22] sm:$0xff]  ;;  %v7703_v25 = vpack.c.bf16 %v7678_v20, %v7690_v56  ;;  %v3333_v23 = vadd.f32 %v5891_v10, %v7653_v18  ;;  %v5893_v2 = vadd.f32 %v5714_v52, %v7503_v22  ;;  %v3272_v12 = vpop.f32.mrb[11].mxu0 }
 0x300   :  { %v3331_v3 = vadd.f32 %v5892_v17, %v7653_v18  ;;  %v5894_v8 = vadd.f32 %v3272_v12, %v7506_v5  ;;  %v7869_v36 = vpack.c.bf16 %v7684_v40, %v7692_v55 }
 0x301   :  { %5722 = vmatmul.mubr.msk.bf16.vlgmr.msra.gmra.mrb[16].mxu1 %vm128_vm4, %v7703_v25  ;;  %v3349_v58 = vmax.f32 %v3333_v23, 0.0  ;;  %v3334_v27 = vadd.f32 %v5893_v2, %v7653_v18 }
 0x302   :  { %5738 = vmatpush3.bf16.msra.mxu1 %v3573_v19  ;;  %v3347_v30 = vmax.f32 %v3331_v3, 0.0  ;;  %v3332_v50 = vadd.f32 %v5894_v8, %v7653_v18  ;;  %v7739_v44 = vld [vmem:[#allocation4 + $0x71] sm:$0xff]  ;;  %v3372_v3 = vld [vmem:[#allocation4] sm:$0xff] }
 0x303   :  { %6304 = vmatprep.subr.msk.bf16.mxu1 %vm3447_vm7, %v7711_v46  ;;  %3366 = vst.msk [vmem:[#allocation4 + $0xd1] sm:$0xff] %vm128_vm4, %v3349_v58  ;;  %v3350_v48 = vmax.f32 %v3334_v27, 0.0  ;;  %v7728_v5 = vld [vmem:[#allocation4 + $0x51] sm:$0xff] }
 0x304   :  { %3364 = vst.msk [vmem:[#allocation4 + $0xb1] sm:$0xff] %vm128_vm4, %v3347_v30  ;;  %v3348_v51 = vmax.f32 %v3332_v50, 0.0  ;;  %v5717_v47 = vpop.f32.mrb[12].mxu0  ;;  %v7733_v57 = vpack.c.bf16 %v7728_v5, %v7682_v63  ;;  %v7753_v28 = vld [vmem:[#allocation4 + $0x52] sm:$0xff] }
 0x305   :  { %3367 = vst.msk [vmem:[#allocation4 + $0xe1] sm:$0xff] %vm128_vm4, %v3350_v48  ;;  %v5895_v1 = vadd.f32 %v5717_v47, %v7511_v26  ;;  %v3285_v13 = vpop.f32.mrb[13].mxu0  ;;  %v7737_v24 = vld [vmem:[#allocation4 + $0x61] sm:$0xff]  ;;  %v7807_v8 = vld [vmem:[#allocation4 + $0x10] sm:$0xff]  ;;  %v7874_v22 = vpack.c.bf16 %v7753_v28, %v7686_v54 }
 0x306   :  { %v7741_v33 = vld [vmem:[#allocation4 + $0x62] sm:$0xff]  ;;  %3365 = vst.msk [vmem:[#allocation4 + $0xc1] sm:$0xff] %vm128_vm4, %v3348_v51  ;;  %v5896_v37 = vadd.f32 %v3285_v13, %v7513_v32  ;;  %v5718_v59 = vpop.f32.mrb[14].mxu0  ;;  %5725 = vmatprep.mubr.msk.bf16.mxu1 %vm128_vm4, %v7733_v57  ;;  %v7749_v0 = vpack.c.bf16 %v7739_v44, %v7737_v24  ;;  %v3388_v51 = vpack.c.bf16 %v7807_v8, %v3372_v3  ;;  %v5106_v47 = vld [vmem:[%s8106_s5 + $0x10] sm:$0xf] }
 0x307   :  { %v3337_v26 = vadd.f32 %v5895_v1, %v7653_v18  ;;  %v5897_v15 = vadd.f32 %v5718_v59, %v7515_v43  ;;  %v3288_v34 = vpop.f32.mrb[15].mxu0  ;;  %v3405_v43 = vld [vmem:[#allocation4 + $0xa1] sm:$0xff]  ;;  %v3375_v59 = vld [vmem:[#allocation4 + $0x30] sm:$0xff]  ;;  %v4055_v29 = vsel %vm3447_vm7, %v5106_v47, 0 }
 0x308   :  { %v3335_v32 = vadd.f32 %v5896_v37, %v7653_v18  ;;  %v5898_v35 = vadd.f32 %v3288_v34, %v7517_v6  ;;  %v3374_v13 = vld [vmem:[#allocation4 + $0x20] sm:$0xff]  ;;  %v7831_v37 = vld [vmem:[#allocation4 + $0x50] sm:$0xff] }
 0x309   :  { %5726 = vmatmul.mubr.msk.bf16.gmra.mrb[20].mxu1 %vm128_vm4, %v7749_v0  ;;  %v3353_v39 = vmax.f32 %v3337_v26, 0.0  ;;  %v3338_v31 = vadd.f32 %v5897_v15, %v7653_v18  ;;  %v7833_v26 = vpack.c.bf16 %v3375_v59, %v3374_v13  ;;  %v3723_v15 = vsel %vm3447_vm7, %v7711_v46, 0  ;;  %v3376_v34 = vld [vmem:[#allocation4 + $0x40] sm:$0xff] }
 0x30a   :  { %v3351_v41 = vmax.f32 %v3335_v32, 0.0  ;;  %v3336_v42 = vadd.f32 %v5898_v35, %v7653_v18  ;;  %v7768_v45 = vld [vmem:[#allocation4 + $0xd1] sm:$0xff]  ;;  %v7838_v32 = vpack.c.bf16 %v7831_v37, %v3376_v34  ;;  %v5097_v35 = vld [vmem:[%s8106_s5 + $0xc] sm:$0xf]  ;;  %v3672_v1 = vld [vmem:[#allocation4 + $0x2] sm:$0xff]  ;;  %v3855_v60 = vpack.c.bf16 %v3376_v34, %v3375_v59 }
 0x30b   :  { %3370 = vst.msk [vmem:[#allocation4 + $0x111] sm:$0xff] %vm128_vm4, %v3353_v39  ;;  %v3354_v62 = vmax.f32 %v3338_v31, 0.0  ;;  %v7766_v53 = vld [vmem:[#allocation4 + $0xb1] sm:$0xff]  ;;  %v3378_v39 = vld [vmem:[#allocation4 + $0x60] sm:$0xff]  ;;  %v3889_v61 = vsel %vm3447_vm7, %v5097_v35, 0 }
 0x30c   :  { %3368 = vst.msk [vmem:[#allocation4 + $0xf1] sm:$0xff] %vm128_vm4, %v3351_v41  ;;  %v3352_v6 = vmax.f32 %v3336_v42, 0.0  ;;  %v3417_v7 = vpack.c.bf16 %v7766_v53, %v3405_v43  ;;  %v7772_v49 = vld [vmem:[#allocation4 + $0xe1] sm:$0xff]  ;;  %v7774_v21 = vld [vmem:[#allocation4 + $0xd2] sm:$0xff] }
 0x30d   :  { %v7776_v14 = vld [vmem:[#allocation4 + $0xe2] sm:$0xff]  ;;  %3371 = vst.msk [vmem:[#allocation4 + $0x121] sm:$0xff] %vm128_vm4, %v3354_v62  ;;  %v7793_v52 = vld [vmem:[#allocation4 + $0xb2] sm:$0xff] }
 0x30e   :  { %v7779_v18 = vld [vmem:[#allocation4 + $0xc1] sm:$0xff]  ;;  %3369 = vst.msk [vmem:[#allocation4 + $0x101] sm:$0xff] %vm128_vm4, %v3352_v6  ;;  %5729 = vmatprep.mubr.msk.bf16.mxu1 %vm128_vm4, %v3417_v7  ;;  %v3381_v46 = vld [vmem:[#allocation4 + $0xb0] sm:$0xff] }
 0x30f   :  { %v7781_v16 = vld [vmem:[#allocation4 + $0xc2] sm:$0xff]  ;;  %v7791_v17 = vpack.c.bf16 %v7768_v45, %v7779_v18  ;;  %v3379_v43 = vld [vmem:[#allocation4 + $0x70] sm:$0xff] }
 0x310   :  { %v3380_v31 = vld [vmem:[#allocation4 + $0xa0] sm:$0xff]  ;;  %v7848_v41 = vpack.c.bf16 %v3379_v43, %v3378_v39  ;;  %v3383_v7 = vld [vmem:[#allocation4 + $0xd0] sm:$0xff] }
 0x311   :  { %5730 = vmatmul.mubr.msk.bf16.gmra.mrb[24].mxu1 %vm128_vm4, %v7791_v17  ;;  %v3392_v42 = vpack.c.bf16 %v3381_v46, %v3380_v31  ;;  %v3382_v62 = vld [vmem:[#allocation4 + $0xc0] sm:$0xff] }
 0x312   :  { %v7811_v27 = vld [vmem:[#allocation4 + $0x111] sm:$0xff]  ;;  %v7853_v3 = vpack.c.bf16 %v3383_v7, %v3382_v62 }
 0x313   :  { %v7801_v2 = vld [vmem:[#allocation4 + $0xf1] sm:$0xff] }
 0x314   :  { %v7805_v12 = vpack.c.bf16 %v7801_v2, %v7772_v49  ;;  %v7821_v48 = vld [vmem:[#allocation4 + $0xf2] sm:$0xff]  ;;  %v3853_v59 = vld [vmem:[#allocation4 + $0x120] sm:$0xff] }
 0x315   :  { %v7809_v58 = vld [vmem:[#allocation4 + $0x101] sm:$0xff]  ;;  %v3385_v6 = vld [vmem:[#allocation4 + $0xf0] sm:$0xff]  ;;  %v7897_v19 = vpack.c.bf16 %v7821_v48, %v7776_v14 }
 0x316   :  { %v7813_v30 = vld [vmem:[#allocation4 + $0x102] sm:$0xff]  ;;  %5733 = vmatprep.mubr.msk.bf16.mxu1 %vm128_vm4, %v7805_v12  ;;  %v7819_v50 = vpack.c.bf16 %v7811_v27, %v7809_v58  ;;  %v3387_v9 = vld [vmem:[#allocation4 + $0x110] sm:$0xff] }
 0x317   :  { %v3386_v31 = vld [vmem:[#allocation4 + $0x100] sm:$0xff]  ;;  %8123 = vst [vmem:[#allocation6_spill] sm:$0xff] %v7897_v19 }
 0x318   :  { %v7861_v23 = vpack.c.bf16 %v3387_v9, %v3386_v31 }
 0x319   :  { %5734 = vmatmul.mubr.msk.bf16.gmra.mrb[28].mxu1 %vm128_vm4, %v7819_v50 }
 0x31a   :  { %5739 = vmatprep.mubr.msk.bf16.mxu1 %vm128_vm4, %v3388_v51  ;;  %v3384_v51 = vld [vmem:[#allocation4 + $0xe0] sm:$0xff] }
 0x321   :  { %5740 = vmatmul.mubr.msk.bf16.vlgmr.msra.gmra.mrb[16].mxu1 %vm128_vm4, %v7833_v26 }
 0x322   :  { %5756 = vmatpush3.bf16.msra.mxu1 %v3723_v15  ;;  %5743 = vmatprep.mubr.msk.bf16.mxu1 %vm128_vm4, %v7838_v32  ;;  %v7855_v15 = vpack.c.bf16 %v3385_v6, %v3384_v51 }
 0x323   :  { %6305 = vmatprep.subr.msk.bf16.mxu1 %vm3447_vm7, %v5097_v35 }
 0x329   :  { %5744 = vmatmul.mubr.msk.bf16.gmra.mrb[20].mxu1 %vm128_vm4, %v7848_v41 }
 0x32a   :  { %5747 = vmatprep.mubr.msk.bf16.mxu1 %vm128_vm4, %v3392_v42  ;;  %v3688_v42 = vpack.c.bf16 %v7713_v11, %v3672_v1  ;;  %v3680_v1 = vld [vmem:[#allocation4 + $0xa2] sm:$0xff] }
 0x32b   :  { %v3692_v10 = vpack.c.bf16 %v7793_v52, %v3680_v1  ;;  %v3687_v1 = vld [vmem:[#allocation4 + $0x112] sm:$0xff] }
 0x32c   :  { %v7904_v38 = vpack.c.bf16 %v3687_v1, %v7813_v30 }
 0x32e   :  { %8124 = vst [vmem:[#allocation7_spill] sm:$0xff] %v7904_v38 }
 0x331   :  { %5748 = vmatmul.mubr.msk.bf16.gmra.mrb[24].mxu1 %vm128_vm4, %v7853_v3 }
 0x332   :  { %5751 = vmatprep.mubr.msk.bf16.mxu1 %vm128_vm4, %v7855_v15 }
 0x339   :  { %5752 = vmatmul.mubr.msk.bf16.gmra.mrb[28].mxu1 %vm128_vm4, %v7861_v23 }
 0x33a   :  { %5757 = vmatprep.mubr.msk.bf16.mxu1 %vm128_vm4, %v3688_v42  ;;  %v3679_v42 = vld [vmem:[#allocation4 + $0x72] sm:$0xff] }
 0x33b   :  { %v7885_v35 = vpack.c.bf16 %v3679_v42, %v7741_v33 }
 0x33d   :  { %8122 = vst [vmem:[#allocation5_spill] sm:$0xff] %v7885_v35 }
 0x341   :  { %5758 = vmatmul.mubr.msk.bf16.vlgmr.msra.gmra.mrb[16].mxu1 %vm128_vm4, %v7869_v36 }
 0x342   :  { %5774 = vmatpush3.bf16.msra.mxu1 %v3889_v61  ;;  %5761 = vmatprep.mubr.msk.bf16.mxu1 %vm128_vm4, %v7874_v22  ;;  %v7893_v61 = vpack.c.bf16 %v7774_v21, %v7781_v16 }
 0x343   :  { %6306 = vmatprep.subr.msk.bf16.mxu1 %vm3447_vm7, %v5106_v47  ;;  %v3859_v47 = vpack.c.bf16 %v3384_v51, %v3383_v7 }
 0x349   :  { %5762 = vmatmul.mubr.msk.bf16.gmra.mrb[20].mxu1 %vm128_vm4, %v7885_v35  ;;  %v3856_v35 = vpack.c.bf16 %v3378_v39, %v7831_v37  ;;  %v3860_v37 = vpack.c.bf16 %v3386_v31, %v3385_v6  ;;  %v8126_v39 = vpack.c.bf16 %v7682_v63, %v7678_v20  ;;  %v8129_v20 = vpack.c.bf16 %v7772_v49, %v7768_v45  ;;  %v5133_v45 = vld [vmem:[%s8106_s5 + $0x1c] sm:$0xf] }
 0x34a   :  { %5765 = vmatprep.mubr.msk.bf16.mxu1 %vm128_vm4, %v3692_v10  ;;  %v3854_v10 = vpack.c.bf16 %v3374_v13, %v7807_v8  ;;  %v3845_v8 = vld [vmem:[#allocation4 + $0x80] sm:$0xff]  ;;  %v8130_v63 = vpack.c.bf16 %v7809_v58, %v7801_v2  ;;  %v8132_v49 = vpack.c.bf16 %v7686_v54, %v7684_v40  ;;  %v8134_v2 = vpack.c.bf16 %v7781_v16, %v7793_v52  ;;  %v4352_v58 = vld [vmem:[#allocation4 + $0x130] sm:$0xff] }
 0x34b   :  { %v3857_v13 = vpack.c.bf16 %v3845_v8, %v3379_v43  ;;  %v8135_v40 = vpack.c.bf16 %v7776_v14, %v7774_v21  ;;  %v8136_v54 = vpack.c.bf16 %v7813_v30, %v7821_v48  ;;  %v4554_v16 = vsel %vm3447_vm7, %v5133_v45, 0  ;;  %v5142_v21 = vld [vmem:[%s8106_s5 + $0x20] sm:$0xf]  ;;  %v4344_v14 = vld [vmem:[#allocation4 + $0x90] sm:$0xff] }
 0x34c   :  { %v4356_v52 = vpack.c.bf16 %v4344_v14, %v3845_v8  ;;  %v4720_v30 = vsel %vm3447_vm7, %v5142_v21, 0  ;;  %v4510_v48 = vld [vmem:[#allocation4 + $0x91] sm:$0xff] }
 0x351   :  { %5766 = vmatmul.mubr.msk.bf16.gmra.mrb[24].mxu1 %vm128_vm4, %v7893_v61 }
 0x352   :  { %5769 = vmatprep.mubr.msk.bf16.mxu1 %vm128_vm4, %v7897_v19  ;;  %v5115_v19 = vld [vmem:[%s8106_s5 + $0x14] sm:$0xf] }
 0x353   :  { %v4221_v34 = vsel %vm3447_vm7, %v5115_v19, 0 }
 0x359   :  { %5770 = vmatmul.mubr.msk.bf16.gmra.mrb[28].mxu1 %vm128_vm4, %v7904_v38  ;;  %v3858_v38 = vpack.c.bf16 %v3382_v62, %v3381_v46 }
 0x35a   :  { %5775 = vmatprep.mubr.msk.bf16.mxu1 %vm128_vm4, %v3854_v10 }
 0x361   :  { %5776 = vmatmul.mubr.msk.bf16.vlgmr.msra.gmra.mrb[16].mxu1 %vm128_vm4, %v3855_v60  ;;  %v3861_v60 = vpack.c.bf16 %v3853_v59, %v3387_v9  ;;  %v8127_v9 = vpack.c.bf16 %v7737_v24, %v7728_v5  ;;  %v4019_v5 = vld [vmem:[#allocation4 + $0x121] sm:$0xff] }
 0x362   :  { %5792 = vmatpush3.bf16.msra.mxu1 %v4055_v29  ;;  %5779 = vmatprep.mubr.msk.bf16.mxu1 %vm128_vm4, %v3856_v35  ;;  %v8125_v29 = vpack.c.bf16 %v7690_v56, %v7676_v4  ;;  %v4011_v4 = vld [vmem:[#allocation4 + $0x81] sm:$0xff]  ;;  %v4027_v24 = vpack.c.bf16 %v4019_v5, %v7811_v27  ;;  %v4360_v27 = vpack.c.bf16 %v4352_v58, %v3853_v59 }
 0x363   :  { %6307 = vmatprep.subr.msk.bf16.mxu1 %vm3447_vm7, %v5115_v19  ;;  %v4023_v56 = vpack.c.bf16 %v4011_v4, %v7739_v44  ;;  %v8128_v19 = vpack.c.bf16 %v7779_v18, %v7766_v53  ;;  %v8131_v44 = vpack.c.bf16 %v7692_v55, %v7713_v11  ;;  %v8133_v18 = vpack.c.bf16 %v7741_v33, %v7753_v28  ;;  %v4177_v55 = vld [vmem:[#allocation4 + $0x82] sm:$0xff] }
 0x364   :  { %v4189_v11 = vpack.c.bf16 %v4177_v55, %v3679_v42  ;;  %v4185_v33 = vld [vmem:[#allocation4 + $0x122] sm:$0xff] }
 0x365   :  { %v4193_v28 = vpack.c.bf16 %v4185_v33, %v3687_v1 }
 0x369   :  { %5780 = vmatmul.mubr.msk.bf16.gmra.mrb[20].mxu1 %vm128_vm4, %v3857_v13 }
 0x36a   :  { %5783 = vmatprep.mubr.msk.bf16.mxu1 %vm128_vm4, %v3858_v38  ;;  %v5124_v38 = vld [vmem:[%s8106_s5 + $0x18] sm:$0xf] }
 0x36b   :  { %v4388_v53 = vsel %vm3447_vm7, %v5124_v38, 0 }
 0x371   :  { %5784 = vmatmul.mubr.msk.bf16.gmra.mrb[24].mxu1 %vm128_vm4, %v3859_v47 }
 0x372   :  { %5787 = vmatprep.mubr.msk.bf16.mxu1 %vm128_vm4, %v3860_v37 }
 0x379   :  { %5788 = vmatmul.mubr.msk.bf16.gmra.mrb[28].mxu1 %vm128_vm4, %v3861_v60 }
 0x37a   :  { %5793 = vmatprep.mubr.msk.bf16.mxu1 %vm128_vm4, %v8125_v29 }
 0x381   :  { %5794 = vmatmul.mubr.msk.bf16.vlgmr.msra.gmra.mrb[16].mxu1 %vm128_vm4, %v8126_v39 }
 0x382   :  { %5810 = vmatpush3.bf16.msra.mxu1 %v4221_v34  ;;  %5797 = vmatprep.mubr.msk.bf16.mxu1 %vm128_vm4, %v8127_v9 }
 0x383   :  { %6308 = vmatprep.subr.msk.bf16.mxu1 %vm3447_vm7, %v5124_v38 }
 0x389   :  { %5798 = vmatmul.mubr.msk.bf16.gmra.mrb[20].mxu1 %vm128_vm4, %v4023_v56 }
 0x38a   :  { %5801 = vmatprep.mubr.msk.bf16.mxu1 %vm128_vm4, %v8128_v19 }
 0x391   :  { %5802 = vmatmul.mubr.msk.bf16.gmra.mrb[24].mxu1 %vm128_vm4, %v8129_v20 }
 0x392   :  { %5805 = vmatprep.mubr.msk.bf16.mxu1 %vm128_vm4, %v8130_v63 }
 0x399   :  { %5806 = vmatmul.mubr.msk.bf16.gmra.mrb[28].mxu1 %vm128_vm4, %v4027_v24 }
 0x39a   :  { %5811 = vmatprep.mubr.msk.bf16.mxu1 %vm128_vm4, %v8131_v44 }
 0x3a1   :  { %5812 = vmatmul.mubr.msk.bf16.vlgmr.msra.gmra.mrb[16].mxu1 %vm128_vm4, %v8132_v49 }
 0x3a2   :  { %5828 = vmatpush3.bf16.msra.mxu1 %v4388_v53  ;;  %5815 = vmatprep.mubr.msk.bf16.mxu1 %vm128_vm4, %v8133_v18 }
 0x3a3   :  { %6309 = vmatprep.subr.msk.bf16.mxu1 %vm3447_vm7, %v5133_v45 }
 0x3a9   :  { %5816 = vmatmul.mubr.msk.bf16.gmra.mrb[20].mxu1 %vm128_vm4, %v4189_v11 }
 0x3aa   :  { %5819 = vmatprep.mubr.msk.bf16.mxu1 %vm128_vm4, %v8134_v2 }
 0x3b1   :  { %5820 = vmatmul.mubr.msk.bf16.gmra.mrb[24].mxu1 %vm128_vm4, %v8135_v40 }
 0x3b2   :  { %5823 = vmatprep.mubr.msk.bf16.mxu1 %vm128_vm4, %v8136_v54 }
 0x3b9   :  { %5824 = vmatmul.mubr.msk.bf16.gmra.mrb[28].mxu1 %vm128_vm4, %v4193_v28 }
 0x3ba   :  { %5829 = vmatprep.mubr.msk.bf16.mxu1 %vm128_vm4, %v7833_v26  ;;  %v4522_v26 = vpack.c.bf16 %v4510_v48, %v4011_v4 }
 0x3c1   :  { %5830 = vmatmul.mubr.msk.bf16.vlgmr.msra.gmra.mrb[16].mxu1 %vm128_vm4, %v7838_v32 }
 0x3c2   :  { %5846 = vmatpush3.bf16.msra.mxu1 %v4554_v16  ;;  %5833 = vmatprep.mubr.msk.bf16.mxu1 %vm128_vm4, %v7848_v41 }
 0x3c3   :  { %6310 = vmatprep.subr.msk.bf16.mxu1 %vm3447_vm7, %v5142_v21 }
 0x3c9   :  { %5834 = vmatmul.mubr.msk.bf16.gmra.mrb[20].mxu1 %vm128_vm4, %v4356_v52 }
 0x3ca   :  { %5837 = vmatprep.mubr.msk.bf16.mxu1 %vm128_vm4, %v7853_v3 }
 0x3d1   :  { %5838 = vmatmul.mubr.msk.bf16.gmra.mrb[24].mxu1 %vm128_vm4, %v7855_v15 }
 0x3d2   :  { %5841 = vmatprep.mubr.msk.bf16.mxu1 %vm128_vm4, %v7861_v23 }
 0x3d9   :  { %5842 = vmatmul.mubr.msk.bf16.gmra.mrb[28].mxu1 %vm128_vm4, %v4360_v27 }
 0x3da   :  { %5847 = vmatprep.mubr.msk.bf16.mxu1 %vm128_vm4, %v7703_v25  ;;  %v4518_v25 = vld [vmem:[#allocation4 + $0x131] sm:$0xff] }
 0x3db   :  { %v4526_v23 = vpack.c.bf16 %v4518_v25, %v4019_v5 }
 0x3e1   :  { %5848 = vmatmul.mubr.msk.bf16.vlgmr.msra.gmra.mrb[16].mxu1 %vm128_vm4, %v7733_v57  ;;  %v8137_v57 = vld [vmem:[#allocation5_spill] sm:$0xff] }
 0x3e2   :  { %5864 = vmatpush3.bf16.msra.mxu1 %v4720_v30  ;;  %5851 = vmatprep.mubr.msk.bf16.mxu1 %vm128_vm4, %v7749_v0  ;;  %v4676_v0 = vld [vmem:[#allocation4 + $0x92] sm:$0xff] }
 0x3e9   :  { %5852 = vmatmul.mubr.msk.bf16.gmra.mrb[20].mxu1 %vm128_vm4, %v4522_v26 }
 0x3ea   :  { %5855 = vmatprep.mubr.msk.bf16.mxu1 %vm128_vm4, %v7791_v17  ;;  %v4688_v17 = vpack.c.bf16 %v4676_v0, %v4177_v55 }
 0x3f1   :  { %5856 = vmatmul.mubr.msk.bf16.gmra.mrb[24].mxu1 %vm128_vm4, %v7805_v12  ;;  %v8138_v12 = vld [vmem:[#allocation6_spill] sm:$0xff] }
 0x3f2   :  { %5859 = vmatprep.mubr.msk.bf16.mxu1 %vm128_vm4, %v7819_v50  ;;  %v8139_v50 = vld [vmem:[#allocation7_spill] sm:$0xff] }
 0x3f9   :  { %5860 = vmatmul.mubr.msk.bf16.gmra.mrb[28].mxu1 %vm128_vm4, %v4526_v23 }
 0x3fa   :  { %5865 = vmatprep.mubr.msk.bf16.mxu1 %vm128_vm4, %v7869_v36  ;;  %v4684_v36 = vld [vmem:[#allocation4 + $0x132] sm:$0xff] }
 0x3fb   :  { %v4692_v32 = vpack.c.bf16 %v4684_v36, %v4185_v33 }
 0x401   :  { %5866 = vmatmul.mubr.msk.bf16.vlgmr.msra.gmra.mrb[16].mxu1 %vm128_vm4, %v7874_v22  ;;  %v5151_v22 = vld [vmem:[%s8108_s6] ss:$0 sm:$0xff] }
 0x402   :  { %5869 = vmatprep.mubr.msk.bf16.mxu1 %vm128_vm4, %v8137_v57 }
 0x409   :  { %5870 = vmatmul.mubr.msk.bf16.gmra.mrb[20].mxu1 %vm128_vm4, %v4688_v17 }
 0x40a   :  { %5873 = vmatprep.mubr.msk.bf16.mxu1 %vm128_vm4, %v7893_v61 }
 0x411   :  { %5874 = vmatmul.mubr.msk.bf16.gmra.mrb[24].mxu1 %vm128_vm4, %v8138_v12 }
 0x412   :  { %5877 = vmatprep.mubr.msk.bf16.mxu1 %vm128_vm4, %v8139_v50 }
 0x419   :  { %5878 = vmatmul.mubr.msk.bf16.gmra.mrb[28].mxu1 %vm128_vm4, %v4692_v32 }
 0x4d4   :  { %v5867_v46 = vpop.f32.mrb[16].mxu1 }
 0x4d5   :  { %v4844_v43 = vadd.f32 %v5867_v46, %v5151_v22  ;;  %v4756_v41 = vpop.f32.mrb[17].mxu1 }
 0x4d6   :  { %v4842_v62 = vadd.f32 %v5151_v22, %v4756_v41  ;;  %v5868_v6 = vpop.f32.mrb[18].mxu1 }
 0x4d7   :  { %v4860_v7 = vmax.f32 %v4844_v43, 0.0  ;;  %v4845_v3 = vadd.f32 %v5868_v6, %v5151_v22  ;;  %v4759_v51 = vpop.f32.mrb[19].mxu1 }
 0x4d8   :  { %v4858_v15 = vmax.f32 %v4842_v62, 0.0  ;;  %v4843_v31 = vadd.f32 %v5151_v22, %v4759_v51 }
 0x4d9   :  { %4876 = vst.msk [vmem:[%s8109_s7 + $0x10] sm:$0xff] %vm128_vm4, %v4860_v7  ;;  %v4861_v42 = vmax.f32 %v4845_v3, 0.0 }
 0x4da   :  { %4874 = vst.msk [vmem:[%s8109_s7] sm:$0xff] %vm128_vm4, %v4858_v15  ;;  %v4859_v35 = vmax.f32 %v4843_v31, 0.0 }
 0x4db   :  { %4877 = vst.msk [vmem:[%s8109_s7 + $0x18] sm:$0xff] %vm128_vm4, %v4861_v42 }
 0x4dc   :  { %4875 = vst.msk [vmem:[%s8109_s7 + $0x8] sm:$0xff] %vm128_vm4, %v4859_v35  ;;  %v5871_v61 = vpop.f32.mrb[20].mxu1 }
 0x4dd   :  { %v4848_v1 = vadd.f32 %v5871_v61, %v5151_v22  ;;  %v4772_v10 = vpop.f32.mrb[21].mxu1 }
 0x4de   :  { %v4846_v8 = vadd.f32 %v5151_v22, %v4772_v10  ;;  %v5872_v13 = vpop.f32.mrb[22].mxu1 }
 0x4df   :  { %v4864_v47 = vmax.f32 %v4848_v1, 0.0  ;;  %v4849_v37 = vadd.f32 %v5872_v13, %v5151_v22  ;;  %v4775_v59 = vpop.f32.mrb[23].mxu1 }
 0x4e0   :  { %v4862_v60 = vmax.f32 %v4846_v8, 0.0  ;;  %v4847_v29 = vadd.f32 %v5151_v22, %v4775_v59 }
 0x4e1   :  { %4880 = vst.msk [vmem:[%s8109_s7 + $0x30] sm:$0xff] %vm128_vm4, %v4864_v47  ;;  %v4865_v34 = vmax.f32 %v4849_v37, 0.0 }
 0x4e2   :  { %4878 = vst.msk [vmem:[%s8109_s7 + $0x20] sm:$0xff] %vm128_vm4, %v4862_v60  ;;  %v4863_v38 = vmax.f32 %v4847_v29, 0.0 }
 0x4e3   :  { %4881 = vst.msk [vmem:[%s8109_s7 + $0x38] sm:$0xff] %vm128_vm4, %v4865_v34 }
 0x4e4   :  { %4879 = vst.msk [vmem:[%s8109_s7 + $0x28] sm:$0xff] %vm128_vm4, %v4863_v38  ;;  %v5875_v39 = vpop.f32.mrb[24].mxu1 }
 0x4e5   :  { %v4852_v9 = vadd.f32 %v5875_v39, %v5151_v22  ;;  %v4788_v4 = vpop.f32.mrb[25].mxu1 }
 0x4e6   :  { %v4850_v56 = vadd.f32 %v5151_v22, %v4788_v4  ;;  %v5876_v19 = vpop.f32.mrb[26].mxu1 }
 0x4e7   :  { %v4868_v20 = vmax.f32 %v4852_v9, 0.0  ;;  %v4853_v63 = vadd.f32 %v5876_v19, %v5151_v22  ;;  %v4791_v5 = vpop.f32.mrb[27].mxu1 }
 0x4e8   :  { %v4866_v24 = vmax.f32 %v4850_v56, 0.0  ;;  %v4851_v44 = vadd.f32 %v5151_v22, %v4791_v5 }
 0x4e9   :  { %4884 = vst.msk [vmem:[%s8109_s7 + $0x50] sm:$0xff] %vm128_vm4, %v4868_v20  ;;  %v4869_v53 = vmax.f32 %v4853_v63, 0.0 }
 0x4ea   :  { %4882 = vst.msk [vmem:[%s8109_s7 + $0x40] sm:$0xff] %vm128_vm4, %v4866_v24  ;;  %v4867_v45 = vmax.f32 %v4851_v44, 0.0 }
 0x4eb   :  { %4885 = vst.msk [vmem:[%s8109_s7 + $0x58] sm:$0xff] %vm128_vm4, %v4869_v53 }
 0x4ec   :  { %4883 = vst.msk [vmem:[%s8109_s7 + $0x48] sm:$0xff] %vm128_vm4, %v4867_v45  ;;  %v5879_v49 = vpop.f32.mrb[28].mxu1 }
 0x4ed   :  { %v4856_v18 = vadd.f32 %v5879_v49, %v5151_v22  ;;  %v4804_v55 = vpop.f32.mrb[29].mxu1 }
 0x4ee   :  { %v4854_v11 = vadd.f32 %v5151_v22, %v4804_v55  ;;  %v5880_v2 = vpop.f32.mrb[30].mxu1 }
 0x4ef   :  { %v4872_v40 = vmax.f32 %v4856_v18, 0.0  ;;  %v4857_v54 = vadd.f32 %v5880_v2, %v5151_v22  ;;  %v4807_v33 = vpop.f32.mrb[31].mxu1 }
 0x4f0   :  { %v4870_v28 = vmax.f32 %v4854_v11, 0.0  ;;  %v4855_v16 = vadd.f32 %v5151_v22, %v4807_v33 }
 0x4f1   :  { %4888 = vst.msk [vmem:[%s8109_s7 + $0x70] sm:$0xff] %vm128_vm4, %v4872_v40  ;;  %v4873_v21 = vmax.f32 %v4857_v54, 0.0 }
 0x4f2   :  { %4886 = vst.msk [vmem:[%s8109_s7 + $0x60] sm:$0xff] %vm128_vm4, %v4870_v28  ;;  %v4871_v14 = vmax.f32 %v4855_v16, 0.0 }
 0x4f3   :  { %4889 = vst.msk [vmem:[%s8109_s7 + $0x78] sm:$0xff] %vm128_vm4, %v4873_v21 }
 0x4f4   :  { %4887 = vst.msk [vmem:[%s8109_s7 + $0x68] sm:$0xff] %vm128_vm4, %v4871_v14 }

</bundles_post_ra>
